<compile_context>
chip_gen: v5e
topology: v5e:2x2
jax: 0.10.0
libtpu: 0.0.40
codegen_flags: <defaults>
</compile_context>

<pallas_src>
import functools

import jax
import jax.numpy as jnp
from jax.experimental import pallas as pl
from jax.experimental.pallas import tpu as pltpu

# --- model hyperparameters (small, consistent with the module) -------------
INPUT_SIZE = 4
HIDDEN = 32
NUM_LAYERS = 2          # block-diagonal fuse below assumes exactly 2 layers
BATCH = 2
SEQ = 8

B_PAD = 8               # pad batch to sublane multiple
LANE = 128              # lane width; 4*HIDDEN == 128 exactly


def lstm_kernel(x_ref, w_ref, out_ref, *, seq_len, batch_pad, hidden):
    """Stacked-LSTM recurrence (wavefront-skewed, fused per wave) + FC head.

    x_ref   : (T*Bp, H)    time-major flattened input
    w_ref   : (104, 2*4H)  packed parameters (see header)
    out_ref : (Bp, 128)
    """
    T, Bp, H = seq_len, batch_pad, hidden
    G = 4 * H           # 128 gate columns per layer
    G2 = 2 * G          # 256: both layers side by side

    # ---- hoisted weight loads (off the recurrence critical path) ----------
    w_rec = w_ref[0:2 * H, :]               # (2H, 2*4H) fused block-diag RHS
    wih0 = w_ref[2 * H:3 * H, 0:G]          # (H, 4H)   layer-0 input weight
    wfc = w_ref[2 * H:3 * H, G:G2]          # (H, 128)  FC weight (col 0 real)
    b0 = w_ref[3 * H:3 * H + 1, 0:G]        # (1, 4H)
    b1 = w_ref[3 * H:3 * H + 1, G:G2]       # (1, 4H)
    bfc = w_ref[3 * H + 1:3 * H + 2, 0:G]   # (1, 128)

    # ---- hoisted layer-0 input projection for ALL time steps --------------
    # One (T*Bp, H) @ (H, 4H) matmul with the (pre-scaled) bias folded in.
    gi0 = jnp.dot(x_ref[...], wih0, preferred_element_type=jnp.float32) + b0

    # Per-wave additive term for BOTH layers: [ gi0(t) | b1 ], hoisted so the
    # wave loop only slices it (JAX does not CSE broadcast_in_dim).
    addend = jnp.concatenate(
        [gi0, jnp.broadcast_to(b1, (T * Bp, G))], axis=1)   # (T*Bp, 2*4H)

    def cell_from_z(z, c_prev):
        # z = tanh of the pre-scaled gates: i/f/o lanes hold tanh(x/2)
        # (i.e. 2*sigmoid(x)-1), g lanes hold tanh(x).  PyTorch order i,f,g,o.
        zi = z[:, 0:H]
        zf = z[:, H:2 * H]
        g = z[:, 2 * H:3 * H]
        zo = z[:, 3 * H:4 * H]
        c_new = 0.5 * ((zf + 1.0) * c_prev + (zi + 1.0) * g)   # f*c + i*g
        h_new = (0.5 * (zo + 1.0)) * jnp.tanh(c_new)           # o*tanh(c)
        return h_new, c_new

    # ---- wave 0: layer 0 at t=0 (zero initial state -> no recurrent matmul)
    z0 = jnp.tanh(addend[0:Bp, 0:G])
    h0, c0 = cell_from_z(z0, jnp.zeros((Bp, H), jnp.float32))
    h1 = jnp.zeros((Bp, H), jnp.float32)
    c1 = jnp.zeros((Bp, H), jnp.float32)

    # ---- waves 1..T-1: both layers, ONE fused matmul + ONE gate tanh ------
    # Wave w runs layer 0 at t=w and layer 1 at t=w-1, both reading the
    # previous wave's hidden states (h0, h1 are read before being rebound).
    for w in range(1, T):
        lhs = jnp.concatenate([h0, h1], axis=1)               # (Bp, 2H)
        gates = (jnp.dot(lhs, w_rec, preferred_element_type=jnp.float32)
                 + addend[w * Bp:(w + 1) * Bp, :])             # (Bp, 2*4H)
        z = jnp.tanh(gates)                                    # one EUP push
        h0n, c0n = cell_from_z(z[:, 0:G], c0)
        h1n, c1n = cell_from_z(z[:, G:G2], c1)
        h0, c0, h1, c1 = h0n, c0n, h1n, c1n

    # ---- wave T: layer 1 only, at t = T-1 ----------------------------------
    lhs = jnp.concatenate([h0, h1], axis=1)
    gates1 = (jnp.dot(lhs, w_rec[:, G:G2], preferred_element_type=jnp.float32)
              + b1)
    z1 = jnp.tanh(gates1)
    h1, c1 = cell_from_z(z1, c1)

    # ---- FC head + sigmoid --------------------------------------------------
    logits = jnp.dot(h1, wfc, preferred_element_type=jnp.float32) + bfc
    out_ref[...] = jax.nn.sigmoid(logits)


@jax.jit
def lstm_model_pallas(x, w_pack):
    """x: (BATCH, SEQ, INPUT_SIZE) float32 -> (BATCH, 1) float32."""
    B, T, D = x.shape
    # pad batch and feature dims, go time-major, flatten (T, Bp) -> rows
    x_pad = jnp.zeros((B_PAD, T, HIDDEN), jnp.float32).at[:B, :, :D].set(x)
    x_tm = jnp.transpose(x_pad, (1, 0, 2)).reshape(T * B_PAD, HIDDEN)

    vmem_spec = pl.BlockSpec(memory_space=pltpu.MemorySpace.VMEM)
    kernel = functools.partial(lstm_kernel, seq_len=T, batch_pad=B_PAD,
                               hidden=HIDDEN)

    out = pl.pallas_call(
        kernel,
        out_shape=jax.ShapeDtypeStruct((B_PAD, LANE), jnp.float32),
        in_specs=[vmem_spec, vmem_spec],   # 2 input DMAs: x + packed params
        out_specs=vmem_spec,
    )(x_tm, w_pack)

    return out[:B, :1]


def init_params(key):
    """Deterministic init matching PyTorch shapes; uniform(-1/sqrt(H), 1/sqrt(H))."""
    bound = 1.0 / (HIDDEN ** 0.5)
    keys = jax.random.split(key, 4 * NUM_LAYERS + 2)
    k = 0

    wih, whh, bih, bhh = [], [], [], []
    for l in range(NUM_LAYERS):
        in_dim = INPUT_SIZE if l == 0 else HIDDEN
        wih.append(jax.random.uniform(keys[k], (4 * HIDDEN, in_dim),
                                      jnp.float32, -bound, bound)); k += 1
        whh.append(jax.random.uniform(keys[k], (4 * HIDDEN, HIDDEN),
                                      jnp.float32, -bound, bound)); k += 1
        bih.append(jax.random.uniform(keys[k], (4 * HIDDEN,),
                                      jnp.float32, -bound, bound)); k += 1
        bhh.append(jax.random.uniform(keys[k], (4 * HIDDEN,),
                                      jnp.float32, -bound, bound)); k += 1
    wfc = jax.random.uniform(keys[k], (1, HIDDEN), jnp.float32, -bound, bound); k += 1
    bfc = jax.random.uniform(keys[k], (1,), jnp.float32, -bound, bound)

    G = 4 * HIDDEN
    # Per-gate-column scale for the sigmoid-via-tanh trick: 0.5 on i/f/o
    # columns, 1.0 on g columns.  Multiplying weights/biases by 0.5 is an
    # exact power-of-2 scaling, so the kernel's tanh(gates/2) matches the
    # reference's sigmoid(gates) bit-for-bit up to transcendental rounding.
    gate_scale = jnp.concatenate([jnp.full((2 * HIDDEN,), 0.5, jnp.float32),
                                  jnp.ones((HIDDEN,), jnp.float32),
                                  jnp.full((HIDDEN,), 0.5, jnp.float32)])

    wih0 = jnp.zeros((HIDDEN, G), jnp.float32).at[:INPUT_SIZE, :].set(wih[0].T)
    wih0 = wih0 * gate_scale
    b0 = (bih[0] + bhh[0]) * gate_scale
    b1 = (bih[1] + bhh[1]) * gate_scale

    # Fused block-diagonal recurrent RHS: [[whh0, wih1], [0, whh1]]  (2H, 8H)
    w_rec = jnp.zeros((2 * HIDDEN, 2 * G), jnp.float32)
    w_rec = w_rec.at[0:HIDDEN, 0:G].set(whh[0].T * gate_scale)
    w_rec = w_rec.at[0:HIDDEN, G:2 * G].set(wih[1].T * gate_scale)
    w_rec = w_rec.at[HIDDEN:2 * HIDDEN, G:2 * G].set(whh[1].T * gate_scale)

    wfc_pad = jnp.zeros((HIDDEN, G), jnp.float32).at[:, 0].set(wfc[0, :])
    bfc_pad = jnp.zeros((G,), jnp.float32).at[0].set(bfc[0])

    rows = 3 * HIDDEN + 2                      # 98
    rows_pad = ((rows + 7) // 8) * 8           # 104 (sublane multiple)
    w_pack = jnp.zeros((rows_pad, 2 * G), jnp.float32)
    w_pack = w_pack.at[0:2 * HIDDEN, :].set(w_rec)
    w_pack = w_pack.at[2 * HIDDEN:3 * HIDDEN, 0:G].set(wih0)
    w_pack = w_pack.at[2 * HIDDEN:3 * HIDDEN, G:2 * G].set(wfc_pad)
    w_pack = w_pack.at[3 * HIDDEN, 0:G].set(b0)
    w_pack = w_pack.at[3 * HIDDEN, G:2 * G].set(b1)
    w_pack = w_pack.at[3 * HIDDEN + 1, 0:G].set(bfc_pad)

    raw = dict(wih=wih, whh=whh, bih=bih, bhh=bhh, wfc=wfc, bfc=bfc)
    return raw, w_pack


def ref_forward(x, raw):
    """Pure-JAX reference mirroring torch nn.LSTM(batch_first=True) + Linear + Sigmoid."""
    B, T, _ = x.shape
    P = jax.lax.Precision.HIGHEST
    inp = x
    for l in range(NUM_LAYERS):
        h = jnp.zeros((B, HIDDEN), jnp.float32)
        c = jnp.zeros((B, HIDDEN), jnp.float32)
        outs = []
        for t in range(T):
            gates = (jnp.dot(inp[:, t, :], raw["wih"][l].T, precision=P)
                     + raw["bih"][l]
                     + jnp.dot(h, raw["whh"][l].T, precision=P)
                     + raw["bhh"][l])
            i_g, f_g, g_g, o_g = jnp.split(gates, 4, axis=-1)
            i_g = jax.nn.sigmoid(i_g)
            f_g = jax.nn.sigmoid(f_g)
            g_g = jnp.tanh(g_g)
            o_g = jax.nn.sigmoid(o_g)
            c = f_g * c + i_g * g_g
            h = o_g * jnp.tanh(c)
            outs.append(h)
        inp = jnp.stack(outs, axis=1)
    logits = jnp.dot(inp[:, -1, :], raw["wfc"].T, precision=P) + raw["bfc"]
    return jax.nn.sigmoid(logits)


if __name__ == "__main__":
    key = jax.random.PRNGKey(0)
    k_params, k_x = jax.random.split(key)
    raw, w_pack = init_params(k_params)
    x = jax.random.normal(k_x, (BATCH, SEQ, INPUT_SIZE), jnp.float32)

    out = lstm_model_pallas(x, w_pack)
    out = jax.block_until_ready(out)

    ref = ref_forward(x, raw)
    assert out.shape == (BATCH, 1)
    # Tolerance covers transcendental-approximation differences between the
    # hardware sigmoid and the tanh-based identity; f32 matmuls keep it tight.
    assert jnp.allclose(out, ref, rtol=1e-4, atol=1e-4), (out, ref)
    print("KERNEL_OK")
</pallas_src>

<mosaic_0001>
module attributes {stable_mosaic.version = 11 : i64} {
  func.func @lstm_kernel(%arg0: memref<64x32xf32, #tpu.memory_space<vmem>>, %arg1: memref<104x256xf32, #tpu.memory_space<vmem>>, %arg2: memref<8x128xf32, #tpu.memory_space<vmem>>) attributes {dimension_semantics = [], scalar_prefetch = 0 : i64, scratch_operands = 0 : i64, tpu.core_type = #tpu.core_type<tc>} {
    %c0 = arith.constant 0 : index
    %c0_0 = arith.constant 0 : index
    %0 = vector.load %arg1[%c0, %c0_0] : memref<104x256xf32, #tpu.memory_space<vmem>>, vector<64x256xf32>
    %c64 = arith.constant 64 : index
    %c0_1 = arith.constant 0 : index
    %1 = vector.load %arg1[%c64, %c0_1] : memref<104x256xf32, #tpu.memory_space<vmem>>, vector<32x128xf32>
    %c64_2 = arith.constant 64 : index
    %c128 = arith.constant 128 : index
    %2 = vector.load %arg1[%c64_2, %c128] : memref<104x256xf32, #tpu.memory_space<vmem>>, vector<32x128xf32>
    %c96 = arith.constant 96 : index
    %c0_3 = arith.constant 0 : index
    %3 = vector.load %arg1[%c96, %c0_3] : memref<104x256xf32, #tpu.memory_space<vmem>>, vector<1x128xf32>
    %c96_4 = arith.constant 96 : index
    %c128_5 = arith.constant 128 : index
    %4 = vector.load %arg1[%c96_4, %c128_5] : memref<104x256xf32, #tpu.memory_space<vmem>>, vector<1x128xf32>
    %c97 = arith.constant 97 : index
    %c0_6 = arith.constant 0 : index
    %5 = vector.load %arg1[%c97, %c0_6] : memref<104x256xf32, #tpu.memory_space<vmem>>, vector<1x128xf32>
    %c0_7 = arith.constant 0 : index
    %c0_8 = arith.constant 0 : index
    %6 = vector.load %arg0[%c0_7, %c0_8] : memref<64x32xf32, #tpu.memory_space<vmem>>, vector<64x32xf32>
    %cst = arith.constant dense<0.000000e+00> : vector<64x128xf32>
    %7 = tpu.matmul %6, %1, %cst {dimension_numbers = #tpu.dot_dimension_numbers<[1], [0], [0], [1], [0, 0, 1, 1], [], []>} : vector<64x32xf32>, vector<32x128xf32>, vector<64x128xf32> -> vector<64x128xf32>
    %8 = vector.broadcast %3 : vector<1x128xf32> to vector<64x128xf32>
    %9 = arith.addf %7, %8 : vector<64x128xf32>
    %10 = vector.shape_cast %4 : vector<1x128xf32> to vector<1x128xf32>
    %11 = vector.broadcast %10 : vector<1x128xf32> to vector<64x128xf32>
    %12 = tpu.concatenate %9, %11 in 1 : vector<64x128xf32>, vector<64x128xf32> -> vector<64x256xf32>
    %13 = vector.extract_strided_slice %12 {offsets = [0, 0], sizes = [8, 128], strides = [1, 1]} : vector<64x256xf32> to vector<8x128xf32>
    %14 = math.tanh %13 : vector<8x128xf32>
    %cst_9 = arith.constant 0.000000e+00 : f32
    %15 = vector.broadcast %cst_9 : f32 to vector<8x32xf32>
    %16 = vector.extract_strided_slice %14 {offsets = [0, 0], sizes = [8, 32], strides = [1, 1]} : vector<8x128xf32> to vector<8x32xf32>
    %17 = vector.extract_strided_slice %14 {offsets = [0, 32], sizes = [8, 32], strides = [1, 1]} : vector<8x128xf32> to vector<8x32xf32>
    %18 = vector.extract_strided_slice %14 {offsets = [0, 64], sizes = [8, 32], strides = [1, 1]} : vector<8x128xf32> to vector<8x32xf32>
    %19 = vector.extract_strided_slice %14 {offsets = [0, 96], sizes = [8, 32], strides = [1, 1]} : vector<8x128xf32> to vector<8x32xf32>
    %cst_10 = arith.constant 1.000000e+00 : f32
    %20 = vector.broadcast %cst_10 : f32 to vector<8x32xf32>
    %21 = arith.addf %17, %20 : vector<8x32xf32>
    %22 = arith.mulf %21, %15 : vector<8x32xf32>
    %cst_11 = arith.constant 1.000000e+00 : f32
    %23 = vector.broadcast %cst_11 : f32 to vector<8x32xf32>
    %24 = arith.addf %16, %23 : vector<8x32xf32>
    %25 = arith.mulf %24, %18 : vector<8x32xf32>
    %26 = arith.addf %22, %25 : vector<8x32xf32>
    %cst_12 = arith.constant 5.000000e-01 : f32
    %27 = vector.broadcast %cst_12 : f32 to vector<8x32xf32>
    %28 = arith.mulf %27, %26 : vector<8x32xf32>
    %cst_13 = arith.constant 1.000000e+00 : f32
    %29 = vector.broadcast %cst_13 : f32 to vector<8x32xf32>
    %30 = arith.addf %19, %29 : vector<8x32xf32>
    %cst_14 = arith.constant 5.000000e-01 : f32
    %31 = vector.broadcast %cst_14 : f32 to vector<8x32xf32>
    %32 = arith.mulf %31, %30 : vector<8x32xf32>
    %33 = math.tanh %28 : vector<8x32xf32>
    %34 = arith.mulf %32, %33 : vector<8x32xf32>
    %cst_15 = arith.constant 0.000000e+00 : f32
    %35 = vector.broadcast %cst_15 : f32 to vector<8x32xf32>
    %cst_16 = arith.constant 0.000000e+00 : f32
    %36 = vector.broadcast %cst_16 : f32 to vector<8x32xf32>
    %37 = tpu.concatenate %34, %35 in 1 : vector<8x32xf32>, vector<8x32xf32> -> vector<8x64xf32>
    %cst_17 = arith.constant dense<0.000000e+00> : vector<8x256xf32>
    %38 = tpu.matmul %37, %0, %cst_17 {dimension_numbers = #tpu.dot_dimension_numbers<[1], [0], [0], [1], [0, 0, 1, 1], [], []>} : vector<8x64xf32>, vector<64x256xf32>, vector<8x256xf32> -> vector<8x256xf32>
    %39 = vector.extract_strided_slice %12 {offsets = [8, 0], sizes = [8, 256], strides = [1, 1]} : vector<64x256xf32> to vector<8x256xf32>
    %40 = arith.addf %38, %39 : vector<8x256xf32>
    %41 = math.tanh %40 : vector<8x256xf32>
    %42 = vector.extract_strided_slice %41 {offsets = [0, 0], sizes = [8, 128], strides = [1, 1]} : vector<8x256xf32> to vector<8x128xf32>
    %43 = vector.extract_strided_slice %42 {offsets = [0, 0], sizes = [8, 32], strides = [1, 1]} : vector<8x128xf32> to vector<8x32xf32>
    %44 = vector.extract_strided_slice %42 {offsets = [0, 32], sizes = [8, 32], strides = [1, 1]} : vector<8x128xf32> to vector<8x32xf32>
    %45 = vector.extract_strided_slice %42 {offsets = [0, 64], sizes = [8, 32], strides = [1, 1]} : vector<8x128xf32> to vector<8x32xf32>
    %46 = vector.extract_strided_slice %42 {offsets = [0, 96], sizes = [8, 32], strides = [1, 1]} : vector<8x128xf32> to vector<8x32xf32>
    %cst_18 = arith.constant 1.000000e+00 : f32
    %47 = vector.broadcast %cst_18 : f32 to vector<8x32xf32>
    %48 = arith.addf %44, %47 : vector<8x32xf32>
    %49 = arith.mulf %48, %28 : vector<8x32xf32>
    %cst_19 = arith.constant 1.000000e+00 : f32
    %50 = vector.broadcast %cst_19 : f32 to vector<8x32xf32>
    %51 = arith.addf %43, %50 : vector<8x32xf32>
    %52 = arith.mulf %51, %45 : vector<8x32xf32>
    %53 = arith.addf %49, %52 : vector<8x32xf32>
    %cst_20 = arith.constant 5.000000e-01 : f32
    %54 = vector.broadcast %cst_20 : f32 to vector<8x32xf32>
    %55 = arith.mulf %54, %53 : vector<8x32xf32>
    %cst_21 = arith.constant 1.000000e+00 : f32
    %56 = vector.broadcast %cst_21 : f32 to vector<8x32xf32>
    %57 = arith.addf %46, %56 : vector<8x32xf32>
    %cst_22 = arith.constant 5.000000e-01 : f32
    %58 = vector.broadcast %cst_22 : f32 to vector<8x32xf32>
    %59 = arith.mulf %58, %57 : vector<8x32xf32>
    %60 = math.tanh %55 : vector<8x32xf32>
    %61 = arith.mulf %59, %60 : vector<8x32xf32>
    %62 = vector.extract_strided_slice %41 {offsets = [0, 128], sizes = [8, 128], strides = [1, 1]} : vector<8x256xf32> to vector<8x128xf32>
    %63 = vector.extract_strided_slice %62 {offsets = [0, 0], sizes = [8, 32], strides = [1, 1]} : vector<8x128xf32> to vector<8x32xf32>
    %64 = vector.extract_strided_slice %62 {offsets = [0, 32], sizes = [8, 32], strides = [1, 1]} : vector<8x128xf32> to vector<8x32xf32>
    %65 = vector.extract_strided_slice %62 {offsets = [0, 64], sizes = [8, 32], strides = [1, 1]} : vector<8x128xf32> to vector<8x32xf32>
    %66 = vector.extract_strided_slice %62 {offsets = [0, 96], sizes = [8, 32], strides = [1, 1]} : vector<8x128xf32> to vector<8x32xf32>
    %cst_23 = arith.constant 1.000000e+00 : f32
    %67 = vector.broadcast %cst_23 : f32 to vector<8x32xf32>
    %68 = arith.addf %64, %67 : vector<8x32xf32>
    %69 = arith.mulf %68, %36 : vector<8x32xf32>
    %cst_24 = arith.constant 1.000000e+00 : f32
    %70 = vector.broadcast %cst_24 : f32 to vector<8x32xf32>
    %71 = arith.addf %63, %70 : vector<8x32xf32>
    %72 = arith.mulf %71, %65 : vector<8x32xf32>
    %73 = arith.addf %69, %72 : vector<8x32xf32>
    %cst_25 = arith.constant 5.000000e-01 : f32
    %74 = vector.broadcast %cst_25 : f32 to vector<8x32xf32>
    %75 = arith.mulf %74, %73 : vector<8x32xf32>
    %cst_26 = arith.constant 1.000000e+00 : f32
    %76 = vector.broadcast %cst_26 : f32 to vector<8x32xf32>
    %77 = arith.addf %66, %76 : vector<8x32xf32>
    %cst_27 = arith.constant 5.000000e-01 : f32
    %78 = vector.broadcast %cst_27 : f32 to vector<8x32xf32>
    %79 = arith.mulf %78, %77 : vector<8x32xf32>
    %80 = math.tanh %75 : vector<8x32xf32>
    %81 = arith.mulf %79, %80 : vector<8x32xf32>
    %82 = tpu.concatenate %61, %81 in 1 : vector<8x32xf32>, vector<8x32xf32> -> vector<8x64xf32>
    %cst_28 = arith.constant dense<0.000000e+00> : vector<8x256xf32>
    %83 = tpu.matmul %82, %0, %cst_28 {dimension_numbers = #tpu.dot_dimension_numbers<[1], [0], [0], [1], [0, 0, 1, 1], [], []>} : vector<8x64xf32>, vector<64x256xf32>, vector<8x256xf32> -> vector<8x256xf32>
    %84 = vector.extract_strided_slice %12 {offsets = [16, 0], sizes = [8, 256], strides = [1, 1]} : vector<64x256xf32> to vector<8x256xf32>
    %85 = arith.addf %83, %84 : vector<8x256xf32>
    %86 = math.tanh %85 : vector<8x256xf32>
    %87 = vector.extract_strided_slice %86 {offsets = [0, 0], sizes = [8, 128], strides = [1, 1]} : vector<8x256xf32> to vector<8x128xf32>
    %88 = vector.extract_strided_slice %87 {offsets = [0, 0], sizes = [8, 32], strides = [1, 1]} : vector<8x128xf32> to vector<8x32xf32>
    %89 = vector.extract_strided_slice %87 {offsets = [0, 32], sizes = [8, 32], strides = [1, 1]} : vector<8x128xf32> to vector<8x32xf32>
    %90 = vector.extract_strided_slice %87 {offsets = [0, 64], sizes = [8, 32], strides = [1, 1]} : vector<8x128xf32> to vector<8x32xf32>
    %91 = vector.extract_strided_slice %87 {offsets = [0, 96], sizes = [8, 32], strides = [1, 1]} : vector<8x128xf32> to vector<8x32xf32>
    %cst_29 = arith.constant 1.000000e+00 : f32
    %92 = vector.broadcast %cst_29 : f32 to vector<8x32xf32>
    %93 = arith.addf %89, %92 : vector<8x32xf32>
    %94 = arith.mulf %93, %55 : vector<8x32xf32>
    %cst_30 = arith.constant 1.000000e+00 : f32
    %95 = vector.broadcast %cst_30 : f32 to vector<8x32xf32>
    %96 = arith.addf %88, %95 : vector<8x32xf32>
    %97 = arith.mulf %96, %90 : vector<8x32xf32>
    %98 = arith.addf %94, %97 : vector<8x32xf32>
    %cst_31 = arith.constant 5.000000e-01 : f32
    %99 = vector.broadcast %cst_31 : f32 to vector<8x32xf32>
    %100 = arith.mulf %99, %98 : vector<8x32xf32>
    %cst_32 = arith.constant 1.000000e+00 : f32
    %101 = vector.broadcast %cst_32 : f32 to vector<8x32xf32>
    %102 = arith.addf %91, %101 : vector<8x32xf32>
    %cst_33 = arith.constant 5.000000e-01 : f32
    %103 = vector.broadcast %cst_33 : f32 to vector<8x32xf32>
    %104 = arith.mulf %103, %102 : vector<8x32xf32>
    %105 = math.tanh %100 : vector<8x32xf32>
    %106 = arith.mulf %104, %105 : vector<8x32xf32>
    %107 = vector.extract_strided_slice %86 {offsets = [0, 128], sizes = [8, 128], strides = [1, 1]} : vector<8x256xf32> to vector<8x128xf32>
    %108 = vector.extract_strided_slice %107 {offsets = [0, 0], sizes = [8, 32], strides = [1, 1]} : vector<8x128xf32> to vector<8x32xf32>
    %109 = vector.extract_strided_slice %107 {offsets = [0, 32], sizes = [8, 32], strides = [1, 1]} : vector<8x128xf32> to vector<8x32xf32>
    %110 = vector.extract_strided_slice %107 {offsets = [0, 64], sizes = [8, 32], strides = [1, 1]} : vector<8x128xf32> to vector<8x32xf32>
    %111 = vector.extract_strided_slice %107 {offsets = [0, 96], sizes = [8, 32], strides = [1, 1]} : vector<8x128xf32> to vector<8x32xf32>
    %cst_34 = arith.constant 1.000000e+00 : f32
    %112 = vector.broadcast %cst_34 : f32 to vector<8x32xf32>
    %113 = arith.addf %109, %112 : vector<8x32xf32>
    %114 = arith.mulf %113, %75 : vector<8x32xf32>
    %cst_35 = arith.constant 1.000000e+00 : f32
    %115 = vector.broadcast %cst_35 : f32 to vector<8x32xf32>
    %116 = arith.addf %108, %115 : vector<8x32xf32>
    %117 = arith.mulf %116, %110 : vector<8x32xf32>
    %118 = arith.addf %114, %117 : vector<8x32xf32>
    %cst_36 = arith.constant 5.000000e-01 : f32
    %119 = vector.broadcast %cst_36 : f32 to vector<8x32xf32>
    %120 = arith.mulf %119, %118 : vector<8x32xf32>
    %cst_37 = arith.constant 1.000000e+00 : f32
    %121 = vector.broadcast %cst_37 : f32 to vector<8x32xf32>
    %122 = arith.addf %111, %121 : vector<8x32xf32>
    %cst_38 = arith.constant 5.000000e-01 : f32
    %123 = vector.broadcast %cst_38 : f32 to vector<8x32xf32>
    %124 = arith.mulf %123, %122 : vector<8x32xf32>
    %125 = math.tanh %120 : vector<8x32xf32>
    %126 = arith.mulf %124, %125 : vector<8x32xf32>
    %127 = tpu.concatenate %106, %126 in 1 : vector<8x32xf32>, vector<8x32xf32> -> vector<8x64xf32>
    %cst_39 = arith.constant dense<0.000000e+00> : vector<8x256xf32>
    %128 = tpu.matmul %127, %0, %cst_39 {dimension_numbers = #tpu.dot_dimension_numbers<[1], [0], [0], [1], [0, 0, 1, 1], [], []>} : vector<8x64xf32>, vector<64x256xf32>, vector<8x256xf32> -> vector<8x256xf32>
    %129 = vector.extract_strided_slice %12 {offsets = [24, 0], sizes = [8, 256], strides = [1, 1]} : vector<64x256xf32> to vector<8x256xf32>
    %130 = arith.addf %128, %129 : vector<8x256xf32>
    %131 = math.tanh %130 : vector<8x256xf32>
    %132 = vector.extract_strided_slice %131 {offsets = [0, 0], sizes = [8, 128], strides = [1, 1]} : vector<8x256xf32> to vector<8x128xf32>
    %133 = vector.extract_strided_slice %132 {offsets = [0, 0], sizes = [8, 32], strides = [1, 1]} : vector<8x128xf32> to vector<8x32xf32>
    %134 = vector.extract_strided_slice %132 {offsets = [0, 32], sizes = [8, 32], strides = [1, 1]} : vector<8x128xf32> to vector<8x32xf32>
    %135 = vector.extract_strided_slice %132 {offsets = [0, 64], sizes = [8, 32], strides = [1, 1]} : vector<8x128xf32> to vector<8x32xf32>
    %136 = vector.extract_strided_slice %132 {offsets = [0, 96], sizes = [8, 32], strides = [1, 1]} : vector<8x128xf32> to vector<8x32xf32>
    %cst_40 = arith.constant 1.000000e+00 : f32
    %137 = vector.broadcast %cst_40 : f32 to vector<8x32xf32>
    %138 = arith.addf %134, %137 : vector<8x32xf32>
    %139 = arith.mulf %138, %100 : vector<8x32xf32>
    %cst_41 = arith.constant 1.000000e+00 : f32
    %140 = vector.broadcast %cst_41 : f32 to vector<8x32xf32>
    %141 = arith.addf %133, %140 : vector<8x32xf32>
    %142 = arith.mulf %141, %135 : vector<8x32xf32>
    %143 = arith.addf %139, %142 : vector<8x32xf32>
    %cst_42 = arith.constant 5.000000e-01 : f32
    %144 = vector.broadcast %cst_42 : f32 to vector<8x32xf32>
    %145 = arith.mulf %144, %143 : vector<8x32xf32>
    %cst_43 = arith.constant 1.000000e+00 : f32
    %146 = vector.broadcast %cst_43 : f32 to vector<8x32xf32>
    %147 = arith.addf %136, %146 : vector<8x32xf32>
    %cst_44 = arith.constant 5.000000e-01 : f32
    %148 = vector.broadcast %cst_44 : f32 to vector<8x32xf32>
    %149 = arith.mulf %148, %147 : vector<8x32xf32>
    %150 = math.tanh %145 : vector<8x32xf32>
    %151 = arith.mulf %149, %150 : vector<8x32xf32>
    %152 = vector.extract_strided_slice %131 {offsets = [0, 128], sizes = [8, 128], strides = [1, 1]} : vector<8x256xf32> to vector<8x128xf32>
    %153 = vector.extract_strided_slice %152 {offsets = [0, 0], sizes = [8, 32], strides = [1, 1]} : vector<8x128xf32> to vector<8x32xf32>
    %154 = vector.extract_strided_slice %152 {offsets = [0, 32], sizes = [8, 32], strides = [1, 1]} : vector<8x128xf32> to vector<8x32xf32>
    %155 = vector.extract_strided_slice %152 {offsets = [0, 64], sizes = [8, 32], strides = [1, 1]} : vector<8x128xf32> to vector<8x32xf32>
    %156 = vector.extract_strided_slice %152 {offsets = [0, 96], sizes = [8, 32], strides = [1, 1]} : vector<8x128xf32> to vector<8x32xf32>
    %cst_45 = arith.constant 1.000000e+00 : f32
    %157 = vector.broadcast %cst_45 : f32 to vector<8x32xf32>
    %158 = arith.addf %154, %157 : vector<8x32xf32>
    %159 = arith.mulf %158, %120 : vector<8x32xf32>
    %cst_46 = arith.constant 1.000000e+00 : f32
    %160 = vector.broadcast %cst_46 : f32 to vector<8x32xf32>
    %161 = arith.addf %153, %160 : vector<8x32xf32>
    %162 = arith.mulf %161, %155 : vector<8x32xf32>
    %163 = arith.addf %159, %162 : vector<8x32xf32>
    %cst_47 = arith.constant 5.000000e-01 : f32
    %164 = vector.broadcast %cst_47 : f32 to vector<8x32xf32>
    %165 = arith.mulf %164, %163 : vector<8x32xf32>
    %cst_48 = arith.constant 1.000000e+00 : f32
    %166 = vector.broadcast %cst_48 : f32 to vector<8x32xf32>
    %167 = arith.addf %156, %166 : vector<8x32xf32>
    %cst_49 = arith.constant 5.000000e-01 : f32
    %168 = vector.broadcast %cst_49 : f32 to vector<8x32xf32>
    %169 = arith.mulf %168, %167 : vector<8x32xf32>
    %170 = math.tanh %165 : vector<8x32xf32>
    %171 = arith.mulf %169, %170 : vector<8x32xf32>
    %172 = tpu.concatenate %151, %171 in 1 : vector<8x32xf32>, vector<8x32xf32> -> vector<8x64xf32>
    %cst_50 = arith.constant dense<0.000000e+00> : vector<8x256xf32>
    %173 = tpu.matmul %172, %0, %cst_50 {dimension_numbers = #tpu.dot_dimension_numbers<[1], [0], [0], [1], [0, 0, 1, 1], [], []>} : vector<8x64xf32>, vector<64x256xf32>, vector<8x256xf32> -> vector<8x256xf32>
    %174 = vector.extract_strided_slice %12 {offsets = [32, 0], sizes = [8, 256], strides = [1, 1]} : vector<64x256xf32> to vector<8x256xf32>
    %175 = arith.addf %173, %174 : vector<8x256xf32>
    %176 = math.tanh %175 : vector<8x256xf32>
    %177 = vector.extract_strided_slice %176 {offsets = [0, 0], sizes = [8, 128], strides = [1, 1]} : vector<8x256xf32> to vector<8x128xf32>
    %178 = vector.extract_strided_slice %177 {offsets = [0, 0], sizes = [8, 32], strides = [1, 1]} : vector<8x128xf32> to vector<8x32xf32>
    %179 = vector.extract_strided_slice %177 {offsets = [0, 32], sizes = [8, 32], strides = [1, 1]} : vector<8x128xf32> to vector<8x32xf32>
    %180 = vector.extract_strided_slice %177 {offsets = [0, 64], sizes = [8, 32], strides = [1, 1]} : vector<8x128xf32> to vector<8x32xf32>
    %181 = vector.extract_strided_slice %177 {offsets = [0, 96], sizes = [8, 32], strides = [1, 1]} : vector<8x128xf32> to vector<8x32xf32>
    %cst_51 = arith.constant 1.000000e+00 : f32
    %182 = vector.broadcast %cst_51 : f32 to vector<8x32xf32>
    %183 = arith.addf %179, %182 : vector<8x32xf32>
    %184 = arith.mulf %183, %145 : vector<8x32xf32>
    %cst_52 = arith.constant 1.000000e+00 : f32
    %185 = vector.broadcast %cst_52 : f32 to vector<8x32xf32>
    %186 = arith.addf %178, %185 : vector<8x32xf32>
    %187 = arith.mulf %186, %180 : vector<8x32xf32>
    %188 = arith.addf %184, %187 : vector<8x32xf32>
    %cst_53 = arith.constant 5.000000e-01 : f32
    %189 = vector.broadcast %cst_53 : f32 to vector<8x32xf32>
    %190 = arith.mulf %189, %188 : vector<8x32xf32>
    %cst_54 = arith.constant 1.000000e+00 : f32
    %191 = vector.broadcast %cst_54 : f32 to vector<8x32xf32>
    %192 = arith.addf %181, %191 : vector<8x32xf32>
    %cst_55 = arith.constant 5.000000e-01 : f32
    %193 = vector.broadcast %cst_55 : f32 to vector<8x32xf32>
    %194 = arith.mulf %193, %192 : vector<8x32xf32>
    %195 = math.tanh %190 : vector<8x32xf32>
    %196 = arith.mulf %194, %195 : vector<8x32xf32>
    %197 = vector.extract_strided_slice %176 {offsets = [0, 128], sizes = [8, 128], strides = [1, 1]} : vector<8x256xf32> to vector<8x128xf32>
    %198 = vector.extract_strided_slice %197 {offsets = [0, 0], sizes = [8, 32], strides = [1, 1]} : vector<8x128xf32> to vector<8x32xf32>
    %199 = vector.extract_strided_slice %197 {offsets = [0, 32], sizes = [8, 32], strides = [1, 1]} : vector<8x128xf32> to vector<8x32xf32>
    %200 = vector.extract_strided_slice %197 {offsets = [0, 64], sizes = [8, 32], strides = [1, 1]} : vector<8x128xf32> to vector<8x32xf32>
    %201 = vector.extract_strided_slice %197 {offsets = [0, 96], sizes = [8, 32], strides = [1, 1]} : vector<8x128xf32> to vector<8x32xf32>
    %cst_56 = arith.constant 1.000000e+00 : f32
    %202 = vector.broadcast %cst_56 : f32 to vector<8x32xf32>
    %203 = arith.addf %199, %202 : vector<8x32xf32>
    %204 = arith.mulf %203, %165 : vector<8x32xf32>
    %cst_57 = arith.constant 1.000000e+00 : f32
    %205 = vector.broadcast %cst_57 : f32 to vector<8x32xf32>
    %206 = arith.addf %198, %205 : vector<8x32xf32>
    %207 = arith.mulf %206, %200 : vector<8x32xf32>
    %208 = arith.addf %204, %207 : vector<8x32xf32>
    %cst_58 = arith.constant 5.000000e-01 : f32
    %209 = vector.broadcast %cst_58 : f32 to vector<8x32xf32>
    %210 = arith.mulf %209, %208 : vector<8x32xf32>
    %cst_59 = arith.constant 1.000000e+00 : f32
    %211 = vector.broadcast %cst_59 : f32 to vector<8x32xf32>
    %212 = arith.addf %201, %211 : vector<8x32xf32>
    %cst_60 = arith.constant 5.000000e-01 : f32
    %213 = vector.broadcast %cst_60 : f32 to vector<8x32xf32>
    %214 = arith.mulf %213, %212 : vector<8x32xf32>
    %215 = math.tanh %210 : vector<8x32xf32>
    %216 = arith.mulf %214, %215 : vector<8x32xf32>
    %217 = tpu.concatenate %196, %216 in 1 : vector<8x32xf32>, vector<8x32xf32> -> vector<8x64xf32>
    %cst_61 = arith.constant dense<0.000000e+00> : vector<8x256xf32>
    %218 = tpu.matmul %217, %0, %cst_61 {dimension_numbers = #tpu.dot_dimension_numbers<[1], [0], [0], [1], [0, 0, 1, 1], [], []>} : vector<8x64xf32>, vector<64x256xf32>, vector<8x256xf32> -> vector<8x256xf32>
    %219 = vector.extract_strided_slice %12 {offsets = [40, 0], sizes = [8, 256], strides = [1, 1]} : vector<64x256xf32> to vector<8x256xf32>
    %220 = arith.addf %218, %219 : vector<8x256xf32>
    %221 = math.tanh %220 : vector<8x256xf32>
    %222 = vector.extract_strided_slice %221 {offsets = [0, 0], sizes = [8, 128], strides = [1, 1]} : vector<8x256xf32> to vector<8x128xf32>
    %223 = vector.extract_strided_slice %222 {offsets = [0, 0], sizes = [8, 32], strides = [1, 1]} : vector<8x128xf32> to vector<8x32xf32>
    %224 = vector.extract_strided_slice %222 {offsets = [0, 32], sizes = [8, 32], strides = [1, 1]} : vector<8x128xf32> to vector<8x32xf32>
    %225 = vector.extract_strided_slice %222 {offsets = [0, 64], sizes = [8, 32], strides = [1, 1]} : vector<8x128xf32> to vector<8x32xf32>
    %226 = vector.extract_strided_slice %222 {offsets = [0, 96], sizes = [8, 32], strides = [1, 1]} : vector<8x128xf32> to vector<8x32xf32>
    %cst_62 = arith.constant 1.000000e+00 : f32
    %227 = vector.broadcast %cst_62 : f32 to vector<8x32xf32>
    %228 = arith.addf %224, %227 : vector<8x32xf32>
    %229 = arith.mulf %228, %190 : vector<8x32xf32>
    %cst_63 = arith.constant 1.000000e+00 : f32
    %230 = vector.broadcast %cst_63 : f32 to vector<8x32xf32>
    %231 = arith.addf %223, %230 : vector<8x32xf32>
    %232 = arith.mulf %231, %225 : vector<8x32xf32>
    %233 = arith.addf %229, %232 : vector<8x32xf32>
    %cst_64 = arith.constant 5.000000e-01 : f32
    %234 = vector.broadcast %cst_64 : f32 to vector<8x32xf32>
    %235 = arith.mulf %234, %233 : vector<8x32xf32>
    %cst_65 = arith.constant 1.000000e+00 : f32
    %236 = vector.broadcast %cst_65 : f32 to vector<8x32xf32>
    %237 = arith.addf %226, %236 : vector<8x32xf32>
    %cst_66 = arith.constant 5.000000e-01 : f32
    %238 = vector.broadcast %cst_66 : f32 to vector<8x32xf32>
    %239 = arith.mulf %238, %237 : vector<8x32xf32>
    %240 = math.tanh %235 : vector<8x32xf32>
    %241 = arith.mulf %239, %240 : vector<8x32xf32>
    %242 = vector.extract_strided_slice %221 {offsets = [0, 128], sizes = [8, 128], strides = [1, 1]} : vector<8x256xf32> to vector<8x128xf32>
    %243 = vector.extract_strided_slice %242 {offsets = [0, 0], sizes = [8, 32], strides = [1, 1]} : vector<8x128xf32> to vector<8x32xf32>
    %244 = vector.extract_strided_slice %242 {offsets = [0, 32], sizes = [8, 32], strides = [1, 1]} : vector<8x128xf32> to vector<8x32xf32>
    %245 = vector.extract_strided_slice %242 {offsets = [0, 64], sizes = [8, 32], strides = [1, 1]} : vector<8x128xf32> to vector<8x32xf32>
    %246 = vector.extract_strided_slice %242 {offsets = [0, 96], sizes = [8, 32], strides = [1, 1]} : vector<8x128xf32> to vector<8x32xf32>
    %cst_67 = arith.constant 1.000000e+00 : f32
    %247 = vector.broadcast %cst_67 : f32 to vector<8x32xf32>
    %248 = arith.addf %244, %247 : vector<8x32xf32>
    %249 = arith.mulf %248, %210 : vector<8x32xf32>
    %cst_68 = arith.constant 1.000000e+00 : f32
    %250 = vector.broadcast %cst_68 : f32 to vector<8x32xf32>
    %251 = arith.addf %243, %250 : vector<8x32xf32>
    %252 = arith.mulf %251, %245 : vector<8x32xf32>
    %253 = arith.addf %249, %252 : vector<8x32xf32>
    %cst_69 = arith.constant 5.000000e-01 : f32
    %254 = vector.broadcast %cst_69 : f32 to vector<8x32xf32>
    %255 = arith.mulf %254, %253 : vector<8x32xf32>
    %cst_70 = arith.constant 1.000000e+00 : f32
    %256 = vector.broadcast %cst_70 : f32 to vector<8x32xf32>
    %257 = arith.addf %246, %256 : vector<8x32xf32>
    %cst_71 = arith.constant 5.000000e-01 : f32
    %258 = vector.broadcast %cst_71 : f32 to vector<8x32xf32>
    %259 = arith.mulf %258, %257 : vector<8x32xf32>
    %260 = math.tanh %255 : vector<8x32xf32>
    %261 = arith.mulf %259, %260 : vector<8x32xf32>
    %262 = tpu.concatenate %241, %261 in 1 : vector<8x32xf32>, vector<8x32xf32> -> vector<8x64xf32>
    %cst_72 = arith.constant dense<0.000000e+00> : vector<8x256xf32>
    %263 = tpu.matmul %262, %0, %cst_72 {dimension_numbers = #tpu.dot_dimension_numbers<[1], [0], [0], [1], [0, 0, 1, 1], [], []>} : vector<8x64xf32>, vector<64x256xf32>, vector<8x256xf32> -> vector<8x256xf32>
    %264 = vector.extract_strided_slice %12 {offsets = [48, 0], sizes = [8, 256], strides = [1, 1]} : vector<64x256xf32> to vector<8x256xf32>
    %265 = arith.addf %263, %264 : vector<8x256xf32>
    %266 = math.tanh %265 : vector<8x256xf32>
    %267 = vector.extract_strided_slice %266 {offsets = [0, 0], sizes = [8, 128], strides = [1, 1]} : vector<8x256xf32> to vector<8x128xf32>
    %268 = vector.extract_strided_slice %267 {offsets = [0, 0], sizes = [8, 32], strides = [1, 1]} : vector<8x128xf32> to vector<8x32xf32>
    %269 = vector.extract_strided_slice %267 {offsets = [0, 32], sizes = [8, 32], strides = [1, 1]} : vector<8x128xf32> to vector<8x32xf32>
    %270 = vector.extract_strided_slice %267 {offsets = [0, 64], sizes = [8, 32], strides = [1, 1]} : vector<8x128xf32> to vector<8x32xf32>
    %271 = vector.extract_strided_slice %267 {offsets = [0, 96], sizes = [8, 32], strides = [1, 1]} : vector<8x128xf32> to vector<8x32xf32>
    %cst_73 = arith.constant 1.000000e+00 : f32
    %272 = vector.broadcast %cst_73 : f32 to vector<8x32xf32>
    %273 = arith.addf %269, %272 : vector<8x32xf32>
    %274 = arith.mulf %273, %235 : vector<8x32xf32>
    %cst_74 = arith.constant 1.000000e+00 : f32
    %275 = vector.broadcast %cst_74 : f32 to vector<8x32xf32>
    %276 = arith.addf %268, %275 : vector<8x32xf32>
    %277 = arith.mulf %276, %270 : vector<8x32xf32>
    %278 = arith.addf %274, %277 : vector<8x32xf32>
    %cst_75 = arith.constant 5.000000e-01 : f32
    %279 = vector.broadcast %cst_75 : f32 to vector<8x32xf32>
    %280 = arith.mulf %279, %278 : vector<8x32xf32>
    %cst_76 = arith.constant 1.000000e+00 : f32
    %281 = vector.broadcast %cst_76 : f32 to vector<8x32xf32>
    %282 = arith.addf %271, %281 : vector<8x32xf32>
    %cst_77 = arith.constant 5.000000e-01 : f32
    %283 = vector.broadcast %cst_77 : f32 to vector<8x32xf32>
    %284 = arith.mulf %283, %282 : vector<8x32xf32>
    %285 = math.tanh %280 : vector<8x32xf32>
    %286 = arith.mulf %284, %285 : vector<8x32xf32>
    %287 = vector.extract_strided_slice %266 {offsets = [0, 128], sizes = [8, 128], strides = [1, 1]} : vector<8x256xf32> to vector<8x128xf32>
    %288 = vector.extract_strided_slice %287 {offsets = [0, 0], sizes = [8, 32], strides = [1, 1]} : vector<8x128xf32> to vector<8x32xf32>
    %289 = vector.extract_strided_slice %287 {offsets = [0, 32], sizes = [8, 32], strides = [1, 1]} : vector<8x128xf32> to vector<8x32xf32>
    %290 = vector.extract_strided_slice %287 {offsets = [0, 64], sizes = [8, 32], strides = [1, 1]} : vector<8x128xf32> to vector<8x32xf32>
    %291 = vector.extract_strided_slice %287 {offsets = [0, 96], sizes = [8, 32], strides = [1, 1]} : vector<8x128xf32> to vector<8x32xf32>
    %cst_78 = arith.constant 1.000000e+00 : f32
    %292 = vector.broadcast %cst_78 : f32 to vector<8x32xf32>
    %293 = arith.addf %289, %292 : vector<8x32xf32>
    %294 = arith.mulf %293, %255 : vector<8x32xf32>
    %cst_79 = arith.constant 1.000000e+00 : f32
    %295 = vector.broadcast %cst_79 : f32 to vector<8x32xf32>
    %296 = arith.addf %288, %295 : vector<8x32xf32>
    %297 = arith.mulf %296, %290 : vector<8x32xf32>
    %298 = arith.addf %294, %297 : vector<8x32xf32>
    %cst_80 = arith.constant 5.000000e-01 : f32
    %299 = vector.broadcast %cst_80 : f32 to vector<8x32xf32>
    %300 = arith.mulf %299, %298 : vector<8x32xf32>
    %cst_81 = arith.constant 1.000000e+00 : f32
    %301 = vector.broadcast %cst_81 : f32 to vector<8x32xf32>
    %302 = arith.addf %291, %301 : vector<8x32xf32>
    %cst_82 = arith.constant 5.000000e-01 : f32
    %303 = vector.broadcast %cst_82 : f32 to vector<8x32xf32>
    %304 = arith.mulf %303, %302 : vector<8x32xf32>
    %305 = math.tanh %300 : vector<8x32xf32>
    %306 = arith.mulf %304, %305 : vector<8x32xf32>
    %307 = tpu.concatenate %286, %306 in 1 : vector<8x32xf32>, vector<8x32xf32> -> vector<8x64xf32>
    %cst_83 = arith.constant dense<0.000000e+00> : vector<8x256xf32>
    %308 = tpu.matmul %307, %0, %cst_83 {dimension_numbers = #tpu.dot_dimension_numbers<[1], [0], [0], [1], [0, 0, 1, 1], [], []>} : vector<8x64xf32>, vector<64x256xf32>, vector<8x256xf32> -> vector<8x256xf32>
    %309 = vector.extract_strided_slice %12 {offsets = [56, 0], sizes = [8, 256], strides = [1, 1]} : vector<64x256xf32> to vector<8x256xf32>
    %310 = arith.addf %308, %309 : vector<8x256xf32>
    %311 = math.tanh %310 : vector<8x256xf32>
    %312 = vector.extract_strided_slice %311 {offsets = [0, 0], sizes = [8, 128], strides = [1, 1]} : vector<8x256xf32> to vector<8x128xf32>
    %313 = vector.extract_strided_slice %312 {offsets = [0, 0], sizes = [8, 32], strides = [1, 1]} : vector<8x128xf32> to vector<8x32xf32>
    %314 = vector.extract_strided_slice %312 {offsets = [0, 32], sizes = [8, 32], strides = [1, 1]} : vector<8x128xf32> to vector<8x32xf32>
    %315 = vector.extract_strided_slice %312 {offsets = [0, 64], sizes = [8, 32], strides = [1, 1]} : vector<8x128xf32> to vector<8x32xf32>
    %316 = vector.extract_strided_slice %312 {offsets = [0, 96], sizes = [8, 32], strides = [1, 1]} : vector<8x128xf32> to vector<8x32xf32>
    %cst_84 = arith.constant 1.000000e+00 : f32
    %317 = vector.broadcast %cst_84 : f32 to vector<8x32xf32>
    %318 = arith.addf %314, %317 : vector<8x32xf32>
    %319 = arith.mulf %318, %280 : vector<8x32xf32>
    %cst_85 = arith.constant 1.000000e+00 : f32
    %320 = vector.broadcast %cst_85 : f32 to vector<8x32xf32>
    %321 = arith.addf %313, %320 : vector<8x32xf32>
    %322 = arith.mulf %321, %315 : vector<8x32xf32>
    %323 = arith.addf %319, %322 : vector<8x32xf32>
    %cst_86 = arith.constant 5.000000e-01 : f32
    %324 = vector.broadcast %cst_86 : f32 to vector<8x32xf32>
    %325 = arith.mulf %324, %323 : vector<8x32xf32>
    %cst_87 = arith.constant 1.000000e+00 : f32
    %326 = vector.broadcast %cst_87 : f32 to vector<8x32xf32>
    %327 = arith.addf %316, %326 : vector<8x32xf32>
    %cst_88 = arith.constant 5.000000e-01 : f32
    %328 = vector.broadcast %cst_88 : f32 to vector<8x32xf32>
    %329 = arith.mulf %328, %327 : vector<8x32xf32>
    %330 = math.tanh %325 : vector<8x32xf32>
    %331 = arith.mulf %329, %330 : vector<8x32xf32>
    %332 = vector.extract_strided_slice %311 {offsets = [0, 128], sizes = [8, 128], strides = [1, 1]} : vector<8x256xf32> to vector<8x128xf32>
    %333 = vector.extract_strided_slice %332 {offsets = [0, 0], sizes = [8, 32], strides = [1, 1]} : vector<8x128xf32> to vector<8x32xf32>
    %334 = vector.extract_strided_slice %332 {offsets = [0, 32], sizes = [8, 32], strides = [1, 1]} : vector<8x128xf32> to vector<8x32xf32>
    %335 = vector.extract_strided_slice %332 {offsets = [0, 64], sizes = [8, 32], strides = [1, 1]} : vector<8x128xf32> to vector<8x32xf32>
    %336 = vector.extract_strided_slice %332 {offsets = [0, 96], sizes = [8, 32], strides = [1, 1]} : vector<8x128xf32> to vector<8x32xf32>
    %cst_89 = arith.constant 1.000000e+00 : f32
    %337 = vector.broadcast %cst_89 : f32 to vector<8x32xf32>
    %338 = arith.addf %334, %337 : vector<8x32xf32>
    %339 = arith.mulf %338, %300 : vector<8x32xf32>
    %cst_90 = arith.constant 1.000000e+00 : f32
    %340 = vector.broadcast %cst_90 : f32 to vector<8x32xf32>
    %341 = arith.addf %333, %340 : vector<8x32xf32>
    %342 = arith.mulf %341, %335 : vector<8x32xf32>
    %343 = arith.addf %339, %342 : vector<8x32xf32>
    %cst_91 = arith.constant 5.000000e-01 : f32
    %344 = vector.broadcast %cst_91 : f32 to vector<8x32xf32>
    %345 = arith.mulf %344, %343 : vector<8x32xf32>
    %cst_92 = arith.constant 1.000000e+00 : f32
    %346 = vector.broadcast %cst_92 : f32 to vector<8x32xf32>
    %347 = arith.addf %336, %346 : vector<8x32xf32>
    %cst_93 = arith.constant 5.000000e-01 : f32
    %348 = vector.broadcast %cst_93 : f32 to vector<8x32xf32>
    %349 = arith.mulf %348, %347 : vector<8x32xf32>
    %350 = math.tanh %345 : vector<8x32xf32>
    %351 = arith.mulf %349, %350 : vector<8x32xf32>
    %352 = tpu.concatenate %331, %351 in 1 : vector<8x32xf32>, vector<8x32xf32> -> vector<8x64xf32>
    %353 = vector.extract_strided_slice %0 {offsets = [0, 128], sizes = [64, 128], strides = [1, 1]} : vector<64x256xf32> to vector<64x128xf32>
    %cst_94 = arith.constant dense<0.000000e+00> : vector<8x128xf32>
    %354 = tpu.matmul %352, %353, %cst_94 {dimension_numbers = #tpu.dot_dimension_numbers<[1], [0], [0], [1], [0, 0, 1, 1], [], []>} : vector<8x64xf32>, vector<64x128xf32>, vector<8x128xf32> -> vector<8x128xf32>
    %355 = vector.broadcast %4 : vector<1x128xf32> to vector<8x128xf32>
    %356 = arith.addf %354, %355 : vector<8x128xf32>
    %357 = math.tanh %356 : vector<8x128xf32>
    %358 = vector.extract_strided_slice %357 {offsets = [0, 0], sizes = [8, 32], strides = [1, 1]} : vector<8x128xf32> to vector<8x32xf32>
    %359 = vector.extract_strided_slice %357 {offsets = [0, 32], sizes = [8, 32], strides = [1, 1]} : vector<8x128xf32> to vector<8x32xf32>
    %360 = vector.extract_strided_slice %357 {offsets = [0, 64], sizes = [8, 32], strides = [1, 1]} : vector<8x128xf32> to vector<8x32xf32>
    %361 = vector.extract_strided_slice %357 {offsets = [0, 96], sizes = [8, 32], strides = [1, 1]} : vector<8x128xf32> to vector<8x32xf32>
    %cst_95 = arith.constant 1.000000e+00 : f32
    %362 = vector.broadcast %cst_95 : f32 to vector<8x32xf32>
    %363 = arith.addf %359, %362 : vector<8x32xf32>
    %364 = arith.mulf %363, %345 : vector<8x32xf32>
    %cst_96 = arith.constant 1.000000e+00 : f32
    %365 = vector.broadcast %cst_96 : f32 to vector<8x32xf32>
    %366 = arith.addf %358, %365 : vector<8x32xf32>
    %367 = arith.mulf %366, %360 : vector<8x32xf32>
    %368 = arith.addf %364, %367 : vector<8x32xf32>
    %cst_97 = arith.constant 5.000000e-01 : f32
    %369 = vector.broadcast %cst_97 : f32 to vector<8x32xf32>
    %370 = arith.mulf %369, %368 : vector<8x32xf32>
    %cst_98 = arith.constant 1.000000e+00 : f32
    %371 = vector.broadcast %cst_98 : f32 to vector<8x32xf32>
    %372 = arith.addf %361, %371 : vector<8x32xf32>
    %cst_99 = arith.constant 5.000000e-01 : f32
    %373 = vector.broadcast %cst_99 : f32 to vector<8x32xf32>
    %374 = arith.mulf %373, %372 : vector<8x32xf32>
    %375 = math.tanh %370 : vector<8x32xf32>
    %376 = arith.mulf %374, %375 : vector<8x32xf32>
    %cst_100 = arith.constant dense<0.000000e+00> : vector<8x128xf32>
    %377 = tpu.matmul %376, %2, %cst_100 {dimension_numbers = #tpu.dot_dimension_numbers<[1], [0], [0], [1], [0, 0, 1, 1], [], []>} : vector<8x32xf32>, vector<32x128xf32>, vector<8x128xf32> -> vector<8x128xf32>
    %378 = vector.broadcast %5 : vector<1x128xf32> to vector<8x128xf32>
    %379 = arith.addf %377, %378 : vector<8x128xf32>
    %380 = arith.negf %379 : vector<8x128xf32>
    %381 = math.exp %380 : vector<8x128xf32>
    %cst_101 = arith.constant 1.000000e+00 : f32
    %382 = vector.broadcast %cst_101 : f32 to vector<8x128xf32>
    %383 = arith.addf %382, %381 : vector<8x128xf32>
    %384 = arith.divf %382, %383 : vector<8x128xf32>
    %c0_102 = arith.constant 0 : index
    %c0_103 = arith.constant 0 : index
    %385 = vector.load %arg2[%c0_102, %c0_103] : memref<8x128xf32, #tpu.memory_space<vmem>>, vector<8x128xf32>
    tpu.vector_store %arg2[%c0_102, %c0_103], %384 {strides = array<i32>} : memref<8x128xf32, #tpu.memory_space<vmem>>, vector<8x128xf32>,
    return
  }
}

</mosaic_0001>

<bundles_post_ra>
// kernel: lstm_model_pallas.1
= control target key start
LH: loop header
LB: loop body
LE: loop exit
PB: predicated region body
PF: predicated region fallthrough
CT: control target
= control target key end

     0   :  { %vm46_vm0 = vcmask 261120   ;;  %s985_s21 = smov 64   ;;  %s986_s22 = smov 32   ;;  %vm138_vm1 = vcmask 523264   ;;  %s1390_s1 = inlined_call_operand.vmem [shape: f32[104,256], index: 1, kind: input, shape index: {}]   ;;  %s1391_s0 = inlined_call_operand.vmem [shape: f32[64,32], index: 0, kind: input, shape index: {}]   ;;  %s1392_s2 = inlined_call_operand.vmem [shape: f32[8,128], index: 2, kind: output, shape index: {}]  }
   0x1   :  { %v30_v0 = vld [vmem:[%s1390_s1 + $0xb0] sm:$0xff]  ;;  %v29_v1 = vld [vmem:[%s1390_s1 + $0xa0] sm:$0xff]  ;;  %v1038_v18 = vld [vmem:[%s1390_s1 + $0x78] sm:$0xff] }
   0x2   :  { %83 = vmatpush.msra.mxu0 %v30_v0  ;;  %v28_v2 = vld [vmem:[%s1390_s1 + $0x90] sm:$0xff]  ;;  %v27_v3 = vld [vmem:[%s1390_s1 + $0x80] sm:$0xff]  ;;  %170 = vmatpush.msra.mxu2 %v1038_v18  ;;  %v1050_v20 = vld [vmem:[%s1390_s1 + $0x68] sm:$0xff] }
   0x3   :  { %v38_v4 = vld [vmem:[%s1391_s0] sm:$0xff]  ;;  %v1033_v17 = vld [vmem:[%s1390_s1 + $0x70] sm:$0xff]  ;;  %v1060_v22 = vld [vmem:[%s1390_s1 + $0x58] sm:$0xff] }
   0x4   :  { %84 = vmatpush.msra.mxu0 %v29_v1  ;;  %v1021_v5 = vld [vmem:[%s1390_s1 + $0xc0] ss:$0 sm:$0xff]  ;;  %150 = vmatpush.msra.mxu1 %v1033_v17  ;;  %v1055_v21 = vld [vmem:[%s1390_s1 + $0x50] sm:$0xff]  ;;  %v1074_v24 = vld [vmem:[%s1390_s1 + $0x48] sm:$0xff] }
   0x5   :  { %v1043_v19 = vld [vmem:[%s1390_s1 + $0x60] sm:$0xff]  ;;  %244 = vmatpush.msra.mxu3 %v1033_v17  ;;  %171 = vmatpush.msra.mxu2 %v1050_v20  ;;  %v39_v25 = vld [vmem:[%s1391_s0 + $0x8] sm:$0xff]  ;;  %v1086_v26 = vld [vmem:[%s1390_s1 + $0x30] sm:$0xff] }
   0x6   :  { %85 = vmatpush.msra.mxu0 %v28_v2  ;;  %151 = vmatpush.msra.mxu1 %v1043_v19  ;;  %v1069_v23 = vld [vmem:[%s1390_s1 + $0x40] sm:$0xff]  ;;  %v1091_v27 = vld [vmem:[%s1390_s1 + $0x38] sm:$0xff]  ;;  %v1105_v29 = vld [vmem:[%s1390_s1 + $0x28] sm:$0xff] }
   0x7   :  { %245 = vmatpush.msra.mxu3 %v1043_v19  ;;  %172 = vmatpush.msra.mxu2 %v1060_v22  ;;  %v1100_v28 = vld [vmem:[%s1390_s1 + $0x20] sm:$0xff]  ;;  %v1114_v30 = vld [vmem:[%s1390_s1 + $0x10] sm:$0xff]  ;;  %v1119_v31 = vld [vmem:[%s1390_s1 + $0x18] sm:$0xff] }
   0x8   :  { %86 = vmatpush.msra.mxu0 %v27_v3  ;;  %152 = vmatpush.msra.mxu1 %v1055_v21  ;;  %v1136_v35 = vld [vmem:[%s1390_s1] sm:$0xff]  ;;  %v1141_v36 = vld [vmem:[%s1390_s1 + $0x8] sm:$0xff] }
   0x9   :  { %890 = vmatmul.msk.f32.vlgmr.msra.gmra.mxu0 %vm46_vm0, %v38_v4  ;;  %246 = vmatpush.msra.mxu3 %v1055_v21  ;;  %v1194_v43 = vld [vmem:[%s1390_s1 + $0xc8] ss:$0 sm:$0xff] }
   0xa   :  { %714 = vmatpush.msrb.mxu0 %v1033_v17  ;;  %153 = vmatpush.msra.mxu1 %v1069_v23 }
   0xb   :  { %173 = vmatpush.msra.mxu2 %v1074_v24  ;;  %247 = vmatpush.msra.mxu3 %v1069_v23 }
   0xc   :  { %715 = vmatpush.msrb.mxu0 %v1043_v19  ;;  %154 = vmatpush.msra.mxu1 %v1086_v26 }
   0xd   :  { %174 = vmatpush.msra.mxu2 %v1091_v27  ;;  %248 = vmatpush.msra.mxu3 %v1086_v26 }
   0xe   :  { %716 = vmatpush.msrb.mxu0 %v1055_v21  ;;  %155 = vmatpush.msra.mxu1 %v1100_v28 }
   0xf   :  { %175 = vmatpush.msra.mxu2 %v1105_v29  ;;  %249 = vmatpush.msra.mxu3 %v1100_v28 }
  0x10   :  { %717 = vmatpush.msrb.mxu0 %v1069_v23  ;;  %156 = vmatpush.msra.mxu1 %v1114_v30 }
  0x11   :  { %891 = vmatmul.msk.f32.gmra.mxu0 %vm46_vm0, %v39_v25  ;;  %176 = vmatpush.msra.mxu2 %v1119_v31 }
  0x12   :  { %718 = vmatpush.msrb.mxu0 %v1086_v26  ;;  %250 = vmatpush.msra.mxu3 %v1114_v30 }
  0x13   :  { %157 = vmatpush.msra.mxu1 %v1136_v35  ;;  %177 = vmatpush.msra.mxu2 %v1141_v36 }
  0x14   :  { %719 = vmatpush.msrb.mxu0 %v1100_v28  ;;  %251 = vmatpush.msra.mxu3 %v1136_v35 }
  0x15   :  { %264 = vmatpush.msrb.mxu1 %v1038_v18  ;;  %338 = vmatpush.msrb.mxu2 %v1033_v17 }
  0x16   :  { %720 = vmatpush.msrb.mxu0 %v1114_v30  ;;  %358 = vmatpush.msrb.mxu3 %v1038_v18 }
  0x17   :  { %265 = vmatpush.msrb.mxu1 %v1050_v20  ;;  %339 = vmatpush.msrb.mxu2 %v1043_v19 }
  0x18   :  { %721 = vmatpush.msrb.mxu0 %v1136_v35  ;;  %359 = vmatpush.msrb.mxu3 %v1050_v20 }
  0x19   :  { %266 = vmatpush.msrb.mxu1 %v1060_v22  ;;  %340 = vmatpush.msrb.mxu2 %v1055_v21 }
  0x1a   :  { %360 = vmatpush.msrb.mxu3 %v1060_v22 }
  0x1b   :  { %267 = vmatpush.msrb.mxu1 %v1074_v24  ;;  %341 = vmatpush.msrb.mxu2 %v1069_v23 }
  0x1c   :  { %361 = vmatpush.msrb.mxu3 %v1074_v24 }
  0x1d   :  { %268 = vmatpush.msrb.mxu1 %v1091_v27  ;;  %342 = vmatpush.msrb.mxu2 %v1086_v26 }
  0x1e   :  { %362 = vmatpush.msrb.mxu3 %v1091_v27 }
  0x1f   :  { %269 = vmatpush.msrb.mxu1 %v1105_v29  ;;  %343 = vmatpush.msrb.mxu2 %v1100_v28 }
  0x20   :  { %363 = vmatpush.msrb.mxu3 %v1105_v29 }
  0x21   :  { %270 = vmatpush.msrb.mxu1 %v1119_v31  ;;  %344 = vmatpush.msrb.mxu2 %v1114_v30 }
  0x22   :  { %364 = vmatpush.msrb.mxu3 %v1119_v31 }
  0x23   :  { %271 = vmatpush.msrb.mxu1 %v1141_v36  ;;  %345 = vmatpush.msrb.mxu2 %v1136_v35 }
  0x24   :  { %365 = vmatpush.msrb.mxu3 %v1141_v36 }
  0x86   :  { %v88_v6 = vpop.f32.mrf.mxu0 }
  0x87   :  { %v89_v7 = vadd.f32 %v88_v6, %v1021_v5 }
  0x89   :  { %917 = vtanh.f32 %v89_v7  ;;  %v40_v7 = vld [vmem:[%s1391_s0 + $0x10] sm:$0xff] }
  0x8a   :  { %892 = vmatmul.msk.f32.gmra.mxu0 %vm46_vm0, %v40_v7 }
  0x8e   :  { %v91_v39 = vpop.f32.mrf.mxu0 }
  0x8f   :  { %v918_v8 = vpop.eup %917  ;;  %v92_v40 = vadd.f32 %v91_v39, %v1021_v5 }
  0x90   :  { %116 = vrot.lane.b32.xlu0 %v918_v8, %s985_s21  ;;  %v113_v9 = vadd.f32 1.0, %v918_v8 }
  0x92   :  { %v114_v12 = vmul.f32 0.0, %v113_v9  ;;  %v126_v32 = vmul.f32 0.5, %v113_v9 }
 0x102   :  { %v117_v10 = vpop.permute.xlu0 %116 }
 0x103   :  { %v119_v11 = vmul.f32 %v117_v10, %v113_v9 }
 0x105   :  { %121 = vrot.lane.b32.xlu0 %v119_v11, %s986_s22 }
 0x177   :  { %v122_v13 = vpop.permute.xlu0 %121 }
 0x178   :  { %v124_v14 = vadd.f32 %v122_v13, %v114_v12  ;;  %v94_v12 = vpop.f32.mrf.mxu0 }
 0x17a   :  { %v1026_v15 = vmul.f32 0.5, %v124_v14  ;;  %v95_v14 = vadd.f32 %v94_v12, %v1021_v5 }
 0x17c   :  { %919 = vtanh.f32 %v1026_v15 }
 0x182   :  { %v920_v16 = vpop.eup %919 }
 0x183   :  { %129 = vrot.lane.b32.xlu1 %v920_v16, %s985_s21 }
 0x1f5   :  { %v130_v33 = vpop.permute.xlu1 %129 }
 0x1f6   :  { %v132_v34 = vmul.f32 %v130_v33, %v126_v32 }
 0x1f8   :  { %134 = vrot.lane.b32.xlu1 %v132_v34, %s986_s22 }
 0x26a   :  { %v135_v37 = vpop.permute.xlu1 %134 }
 0x26b   :  { %v137_v38 = vsel %vm46_vm0, %v135_v37, 0.0 }
 0x26c   :  { %898 = vmatmul.msk.f32.vlgmr.msra.gmra.mxu1 %vm138_vm1, %v137_v38  ;;  %899 = vmatmul.msk.f32.vlgmr.msra.gmra.mxu2 %vm138_vm1, %v137_v38 }
 0x26d   :  { %432 = vmatpush.msra.mxu1 %v1033_v17  ;;  %452 = vmatpush.msra.mxu2 %v1038_v18 }
 0x26f   :  { %433 = vmatpush.msra.mxu1 %v1043_v19  ;;  %453 = vmatpush.msra.mxu2 %v1050_v20 }
 0x271   :  { %434 = vmatpush.msra.mxu1 %v1055_v21  ;;  %454 = vmatpush.msra.mxu2 %v1060_v22 }
 0x273   :  { %435 = vmatpush.msra.mxu1 %v1069_v23  ;;  %455 = vmatpush.msra.mxu2 %v1074_v24 }
 0x275   :  { %436 = vmatpush.msra.mxu1 %v1086_v26  ;;  %456 = vmatpush.msra.mxu2 %v1091_v27 }
 0x277   :  { %437 = vmatpush.msra.mxu1 %v1100_v28  ;;  %457 = vmatpush.msra.mxu2 %v1105_v29 }
 0x279   :  { %438 = vmatpush.msra.mxu1 %v1114_v30  ;;  %458 = vmatpush.msra.mxu2 %v1119_v31 }
 0x27b   :  { %439 = vmatpush.msra.mxu1 %v1136_v35  ;;  %459 = vmatpush.msra.mxu2 %v1141_v36 }
 0x2e9   :  { %v159_v41 = vpop.f32.mrf.mxu1 }
 0x2ea   :  { %v160_v42 = vadd.f32 %v159_v41, %v92_v40 }
 0x2ec   :  { %921 = vtanh.f32 %v160_v42 }
 0x2ef   :  { %v179_v44 = vpop.f32.mrf.mxu2 }
 0x2f0   :  { %v180_v45 = vadd.f32 %v179_v44, %v1194_v43 }
 0x2f2   :  { %v922_v46 = vpop.eup %921  ;;  %923 = vtanh.f32 %v180_v45 }
 0x2f3   :  { %187 = vrot.lane.b32.xlu2 %v922_v46, %s985_s21  ;;  %v184_v48 = vadd.f32 1.0, %v922_v46 }
 0x2f5   :  { %v185_v54 = vmul.f32 %v184_v48, %v1026_v15  ;;  %v197_v0 = vmul.f32 0.5, %v184_v48 }
 0x2f8   :  { %v924_v47 = vpop.eup %923 }
 0x2f9   :  { %v204_v51 = vadd.f32 1.0, %v924_v47 }
 0x2fb   :  { %207 = vrot.lane.b32.xlu2 %v924_v47, %s985_s21  ;;  %v205_v58 = vmul.f32 0.0, %v204_v51  ;;  %v217_v3 = vmul.f32 0.5, %v204_v51 }
 0x34d   :  { %v188_v49 = vpop.permute.xlu2 %187 }
 0x34e   :  { %v190_v50 = vmul.f32 %v188_v49, %v184_v48 }
 0x350   :  { %192 = vrot.lane.b32.xlu0 %v190_v50, %s986_s22 }
 0x355   :  { %v208_v52 = vpop.permute.xlu2 %207 }
 0x356   :  { %v210_v53 = vmul.f32 %v208_v52, %v204_v51 }
 0x358   :  { %212 = vrot.lane.b32.xlu1 %v210_v53, %s986_s22 }
 0x3c2   :  { %v193_v55 = vpop.permute.xlu0 %192 }
 0x3c3   :  { %v195_v56 = vadd.f32 %v193_v55, %v185_v54 }
 0x3c5   :  { %v196_v57 = vmul.f32 0.5, %v195_v56 }
 0x3c7   :  { %925 = vtanh.f32 %v196_v57 }
 0x3ca   :  { %v213_v59 = vpop.permute.xlu1 %212 }
 0x3cb   :  { %v215_v60 = vadd.f32 %v213_v59, %v205_v58  ;;  %v41_v58 = vld [vmem:[%s1391_s0 + $0x18] sm:$0xff] }
 0x3cc   :  { %893 = vmatmul.msk.f32.gmra.mxu0 %vm46_vm0, %v41_v58 }
 0x3cd   :  { %v926_v61 = vpop.eup %925  ;;  %v1202_v62 = vmul.f32 0.5, %v215_v60 }
 0x3ce   :  { %200 = vrot.lane.b32.xlu2 %v926_v61, %s985_s21 }
 0x3cf   :  { %927 = vtanh.f32 %v1202_v62 }
 0x3d5   :  { %v928_v63 = vpop.eup %927 }
 0x3d6   :  { %220 = vrot.lane.b32.xlu0 %v928_v63, %s985_s21 }
 0x428   :  { %v201_v1 = vpop.permute.xlu2 %200 }
 0x429   :  { %v203_v2 = vmul.f32 %v201_v1, %v197_v0 }
 0x42b   :  { %225 = vrot.lane.b32.xlu1 %v203_v2, %s986_s22 }
 0x448   :  { %v221_v4 = vpop.permute.xlu0 %220 }
 0x449   :  { %v223_v6 = vmul.f32 %v221_v4, %v217_v3 }
 0x44b   :  { %229 = vrot.lane.b32.xlu2 %v223_v6, %s985_s21 }
 0x49d   :  { %v226_v8 = vpop.permute.xlu1 %225 }
 0x4a5   :  { %v230_v9 = vpop.permute.xlu2 %229 }
 0x4a6   :  { %v232_v10 = vsel %vm46_vm0, %v226_v8, %v230_v9 }
 0x4a7   :  { %900 = vmatmul.msk.f32.vlgmr.msra.gmra.mxu3 %vm138_vm1, %v232_v10  ;;  %901 = vmatmul.msk.f32.vlgmr.msrb.gmra.mxu1 %vm138_vm1, %v232_v10 }
 0x4a8   :  { %526 = vmatpush.msra.mxu3 %v1033_v17  ;;  %546 = vmatpush.msrb.mxu1 %v1038_v18 }
 0x4aa   :  { %527 = vmatpush.msra.mxu3 %v1043_v19  ;;  %547 = vmatpush.msrb.mxu1 %v1050_v20 }
 0x4ac   :  { %528 = vmatpush.msra.mxu3 %v1055_v21  ;;  %548 = vmatpush.msrb.mxu1 %v1060_v22 }
 0x4ae   :  { %529 = vmatpush.msra.mxu3 %v1069_v23  ;;  %549 = vmatpush.msrb.mxu1 %v1074_v24 }
 0x4b0   :  { %530 = vmatpush.msra.mxu3 %v1086_v26  ;;  %550 = vmatpush.msrb.mxu1 %v1091_v27 }
 0x4b2   :  { %531 = vmatpush.msra.mxu3 %v1100_v28  ;;  %551 = vmatpush.msrb.mxu1 %v1105_v29 }
 0x4b4   :  { %532 = vmatpush.msra.mxu3 %v1114_v30  ;;  %552 = vmatpush.msrb.mxu1 %v1119_v31 }
 0x4b6   :  { %533 = vmatpush.msra.mxu3 %v1136_v35  ;;  %553 = vmatpush.msrb.mxu1 %v1141_v36 }
 0x524   :  { %v273_v11 = vpop.f32.mrf.mxu1 }
 0x525   :  { %v274_v13 = vadd.f32 %v273_v11, %v1194_v43 }
 0x527   :  { %929 = vtanh.f32 %v274_v13 }
 0x52a   :  { %v253_v15 = vpop.f32.mrf.mxu3 }
 0x52b   :  { %v254_v16 = vadd.f32 %v253_v15, %v95_v14 }
 0x52d   :  { %v930_v25 = vpop.eup %929  ;;  %931 = vtanh.f32 %v254_v16 }
 0x52e   :  { %301 = vrot.lane.b32.xlu1 %v930_v25, %s985_s21  ;;  %v298_v33 = vadd.f32 1.0, %v930_v25 }
 0x530   :  { %v299_v47 = vmul.f32 %v298_v33, %v1202_v62  ;;  %v311_v52 = vmul.f32 0.5, %v298_v33 }
 0x533   :  { %v932_v32 = vpop.eup %931 }
 0x534   :  { %281 = vrot.lane.b32.xlu0 %v932_v32, %s985_s21  ;;  %v278_v38 = vadd.f32 1.0, %v932_v32 }
 0x536   :  { %v279_v41 = vmul.f32 %v278_v38, %v196_v57  ;;  %v291_v55 = vmul.f32 0.5, %v278_v38 }
 0x5a0   :  { %v302_v34 = vpop.permute.xlu1 %301 }
 0x5a1   :  { %v304_v37 = vmul.f32 %v302_v34, %v298_v33 }
 0x5a3   :  { %306 = vrot.lane.b32.xlu0 %v304_v37, %s986_s22  ;;  %v42_v37 = vld [vmem:[%s1391_s0 + $0x20] sm:$0xff] }
 0x5a4   :  { %894 = vmatmul.msk.f32.gmra.mxu0 %vm46_vm0, %v42_v37 }
 0x5a6   :  { %v282_v39 = vpop.permute.xlu0 %281 }
 0x5a7   :  { %v284_v40 = vmul.f32 %v282_v39, %v278_v38 }
 0x5a9   :  { %286 = vrot.lane.b32.xlu2 %v284_v40, %s986_s22 }
 0x603   :  { %v287_v42 = vpop.permute.xlu2 %286 }
 0x604   :  { %v289_v44 = vadd.f32 %v287_v42, %v279_v41 }
 0x606   :  { %v290_v45 = vmul.f32 0.5, %v289_v44 }
 0x608   :  { %933 = vtanh.f32 %v290_v45 }
 0x60e   :  { %v934_v46 = vpop.eup %933 }
 0x60f   :  { %294 = vrot.lane.b32.xlu1 %v934_v46, %s985_s21 }
 0x615   :  { %v307_v48 = vpop.permute.xlu0 %306 }
 0x616   :  { %v309_v49 = vadd.f32 %v307_v48, %v299_v47 }
 0x618   :  { %v310_v50 = vmul.f32 0.5, %v309_v49 }
 0x61a   :  { %935 = vtanh.f32 %v310_v50 }
 0x620   :  { %v936_v51 = vpop.eup %935 }
 0x621   :  { %314 = vrot.lane.b32.xlu2 %v936_v51, %s985_s21 }
 0x67b   :  { %v315_v53 = vpop.permute.xlu2 %314 }
 0x67c   :  { %v317_v54 = vmul.f32 %v315_v53, %v311_v52 }
 0x67e   :  { %323 = vrot.lane.b32.xlu1 %v317_v54, %s985_s21 }
 0x681   :  { %v295_v56 = vpop.permute.xlu1 %294 }
 0x682   :  { %v297_v57 = vmul.f32 %v295_v56, %v291_v55 }
 0x684   :  { %319 = vrot.lane.b32.xlu0 %v297_v57, %s986_s22 }
 0x6f0   :  { %v324_v59 = vpop.permute.xlu1 %323 }
 0x6f6   :  { %v320_v60 = vpop.permute.xlu0 %319 }
 0x6f7   :  { %v326_v61 = vsel %vm46_vm0, %v320_v60, %v324_v59 }
 0x6f8   :  { %902 = vmatmul.msk.f32.vlgmr.msrb.gmra.mxu2 %vm138_vm1, %v326_v61  ;;  %903 = vmatmul.msk.f32.vlgmr.msrb.gmra.mxu3 %vm138_vm1, %v326_v61 }
 0x6f9   :  { %620 = vmatpush.msrb.mxu2 %v1033_v17  ;;  %640 = vmatpush.msrb.mxu3 %v1038_v18  ;;  %v97_v17 = vpop.f32.mrf.mxu0 }
 0x6fb   :  { %621 = vmatpush.msrb.mxu2 %v1043_v19  ;;  %641 = vmatpush.msrb.mxu3 %v1050_v20  ;;  %v98_v19 = vadd.f32 %v97_v17, %v1021_v5 }
 0x6fd   :  { %622 = vmatpush.msrb.mxu2 %v1055_v21  ;;  %642 = vmatpush.msrb.mxu3 %v1060_v22 }
 0x6ff   :  { %623 = vmatpush.msrb.mxu2 %v1069_v23  ;;  %643 = vmatpush.msrb.mxu3 %v1074_v24 }
 0x701   :  { %624 = vmatpush.msrb.mxu2 %v1086_v26  ;;  %644 = vmatpush.msrb.mxu3 %v1091_v27 }
 0x703   :  { %625 = vmatpush.msrb.mxu2 %v1100_v28  ;;  %645 = vmatpush.msrb.mxu3 %v1105_v29 }
 0x705   :  { %626 = vmatpush.msrb.mxu2 %v1114_v30  ;;  %646 = vmatpush.msrb.mxu3 %v1119_v31 }
 0x707   :  { %627 = vmatpush.msrb.mxu2 %v1136_v35  ;;  %647 = vmatpush.msrb.mxu3 %v1141_v36 }
 0x77b   :  { %v347_v21 = vpop.f32.mrf.mxu2  ;;  %v367_v23 = vpop.f32.mrf.mxu3 }
 0x77c   :  { %v348_v26 = vadd.f32 %v347_v21, %v98_v19  ;;  %v368_v62 = vadd.f32 %v367_v23, %v1194_v43  ;;  %v43_v21 = vld [vmem:[%s1391_s0 + $0x28] sm:$0xff] }
 0x77d   :  { %895 = vmatmul.msk.f32.gmra.mxu0 %vm46_vm0, %v43_v21 }
 0x77e   :  { %937 = vtanh.f32 %v348_v26 }
 0x77f   :  { %939 = vtanh.f32 %v368_v62 }
 0x784   :  { %v938_v28 = vpop.eup %937 }
 0x785   :  { %v940_v63 = vpop.eup %939  ;;  %375 = vrot.lane.b32.xlu2 %v938_v28, %s985_s21  ;;  %v372_v30 = vadd.f32 1.0, %v938_v28 }
 0x786   :  { %395 = vrot.lane.b32.xlu0 %v940_v63, %s985_s21  ;;  %v392_v1 = vadd.f32 1.0, %v940_v63 }
 0x787   :  { %v373_v4 = vmul.f32 %v372_v30, %v290_v45  ;;  %v385_v15 = vmul.f32 0.5, %v372_v30 }
 0x788   :  { %v393_v6 = vmul.f32 %v392_v1, %v310_v50  ;;  %v405_v16 = vmul.f32 0.5, %v392_v1 }
 0x7df   :  { %v376_v35 = vpop.permute.xlu2 %375 }
 0x7e0   :  { %v378_v0 = vmul.f32 %v376_v35, %v372_v30 }
 0x7e2   :  { %380 = vrot.lane.b32.xlu1 %v378_v0, %s986_s22 }
 0x7f8   :  { %v396_v2 = vpop.permute.xlu0 %395 }
 0x7f9   :  { %v398_v3 = vmul.f32 %v396_v2, %v392_v1 }
 0x7fb   :  { %400 = vrot.lane.b32.xlu2 %v398_v3, %s986_s22 }
 0x854   :  { %v381_v7 = vpop.permute.xlu1 %380 }
 0x855   :  { %v401_v8 = vpop.permute.xlu2 %400  ;;  %v383_v9 = vadd.f32 %v381_v7, %v373_v4 }
 0x856   :  { %v403_v10 = vadd.f32 %v401_v8, %v393_v6 }
 0x857   :  { %v1272_v11 = vmul.f32 0.5, %v383_v9 }
 0x858   :  { %v404_v12 = vmul.f32 0.5, %v403_v10 }
 0x859   :  { %941 = vtanh.f32 %v1272_v11 }
 0x85a   :  { %943 = vtanh.f32 %v404_v12 }
 0x85f   :  { %v942_v13 = vpop.eup %941 }
 0x860   :  { %v944_v14 = vpop.eup %943  ;;  %388 = vrot.lane.b32.xlu0 %v942_v13, %s985_s21 }
 0x861   :  { %408 = vrot.lane.b32.xlu1 %v944_v14, %s985_s21 }
 0x8d2   :  { %v389_v25 = vpop.permute.xlu0 %388 }
 0x8d3   :  { %v409_v32 = vpop.permute.xlu1 %408  ;;  %v391_v33 = vmul.f32 %v389_v25, %v385_v15 }
 0x8d4   :  { %v411_v34 = vmul.f32 %v409_v32, %v405_v16 }
 0x8d5   :  { %413 = vrot.lane.b32.xlu2 %v391_v33, %s986_s22 }
 0x8d6   :  { %417 = vrot.lane.b32.xlu0 %v411_v34, %s985_s21 }
 0x92f   :  { %v414_v38 = vpop.permute.xlu2 %413 }
 0x948   :  { %v418_v39 = vpop.permute.xlu0 %417 }
 0x949   :  { %v420_v40 = vsel %vm46_vm0, %v414_v38, %v418_v39 }
 0x94a   :  { %904 = vmatmul.msk.f32.vlgmr.msra.gmra.mxu1 %vm138_vm1, %v420_v40  ;;  %905 = vmatmul.msk.f32.vlgmr.msra.gmra.mxu2 %vm138_vm1, %v420_v40 }
 0x94b   :  { %734 = vmatpush.msra.mxu1 %v1038_v18  ;;  %808 = vmatpush.msra.mxu2 %v1038_v18  ;;  %v100_v18 = vpop.f32.mrf.mxu0 }
 0x94d   :  { %735 = vmatpush.msra.mxu1 %v1050_v20  ;;  %809 = vmatpush.msra.mxu2 %v1050_v20  ;;  %v101_v20 = vadd.f32 %v100_v18, %v1021_v5 }
 0x94f   :  { %736 = vmatpush.msra.mxu1 %v1060_v22  ;;  %810 = vmatpush.msra.mxu2 %v1060_v22 }
 0x951   :  { %737 = vmatpush.msra.mxu1 %v1074_v24  ;;  %811 = vmatpush.msra.mxu2 %v1074_v24 }
 0x953   :  { %738 = vmatpush.msra.mxu1 %v1091_v27  ;;  %812 = vmatpush.msra.mxu2 %v1091_v27  ;;  %v103_v63 = vpop.f32.mrf.mxu0 }
 0x954   :  { %v104_v35 = vadd.f32 %v103_v63, %v1021_v5 }
 0x955   :  { %739 = vmatpush.msra.mxu1 %v1105_v29  ;;  %813 = vmatpush.msra.mxu2 %v1105_v29 }
 0x957   :  { %740 = vmatpush.msra.mxu1 %v1119_v31  ;;  %814 = vmatpush.msra.mxu2 %v1119_v31 }
 0x959   :  { %741 = vmatpush.msra.mxu1 %v1141_v36  ;;  %815 = vmatpush.msra.mxu2 %v1141_v36 }
 0x9c7   :  { %v441_v22 = vpop.f32.mrf.mxu1 }
 0x9c8   :  { %v442_v24 = vadd.f32 %v441_v22, %v101_v20  ;;  %v44_v22 = vld [vmem:[%s1391_s0 + $0x30] sm:$0xff] }
 0x9c9   :  { %896 = vmatmul.msk.f32.gmra.mxu0 %vm46_vm0, %v44_v22 }
 0x9ca   :  { %945 = vtanh.f32 %v442_v24 }
 0x9cd   :  { %v461_v41 = vpop.f32.mrf.mxu2 }
 0x9ce   :  { %v462_v27 = vadd.f32 %v461_v41, %v1194_v43 }
 0x9d0   :  { %v946_v42 = vpop.eup %945  ;;  %947 = vtanh.f32 %v462_v27 }
 0x9d1   :  { %469 = vrot.lane.b32.xlu1 %v946_v42, %s985_s21  ;;  %v466_v36 = vadd.f32 1.0, %v946_v42 }
 0x9d3   :  { %v467_v53 = vmul.f32 %v466_v36, %v1272_v11  ;;  %v479_v58 = vmul.f32 0.5, %v466_v36 }
 0x9d6   :  { %v948_v29 = vpop.eup %947 }
 0x9d7   :  { %489 = vrot.lane.b32.xlu2 %v948_v29, %s985_s21  ;;  %v486_v31 = vadd.f32 1.0, %v948_v29 }
 0x9d9   :  { %v487_v48 = vmul.f32 %v486_v31, %v404_v12  ;;  %v499_v61 = vmul.f32 0.5, %v486_v31 }
 0xa31   :  { %v490_v44 = vpop.permute.xlu2 %489 }
 0xa32   :  { %v492_v45 = vmul.f32 %v490_v44, %v486_v31 }
 0xa34   :  { %494 = vrot.lane.b32.xlu1 %v492_v45, %s986_s22 }
 0xa43   :  { %v470_v46 = vpop.permute.xlu1 %469 }
 0xa44   :  { %v472_v47 = vmul.f32 %v470_v46, %v466_v36 }
 0xa46   :  { %474 = vrot.lane.b32.xlu0 %v472_v47, %s986_s22  ;;  %v106_v42 = vpop.f32.mrf.mxu0 }
 0xa47   :  { %v107_v29 = vadd.f32 %v106_v42, %v1021_v5 }
 0xaa6   :  { %v495_v49 = vpop.permute.xlu1 %494 }
 0xaa7   :  { %v497_v50 = vadd.f32 %v495_v49, %v487_v48 }
 0xaa9   :  { %v498_v51 = vmul.f32 0.5, %v497_v50 }
 0xaab   :  { %949 = vtanh.f32 %v498_v51 }
 0xab1   :  { %v950_v52 = vpop.eup %949 }
 0xab2   :  { %502 = vrot.lane.b32.xlu0 %v950_v52, %s985_s21 }
 0xab8   :  { %v475_v54 = vpop.permute.xlu0 %474 }
 0xab9   :  { %v477_v55 = vadd.f32 %v475_v54, %v467_v53 }
 0xabb   :  { %v478_v56 = vmul.f32 0.5, %v477_v55 }
 0xabd   :  { %951 = vtanh.f32 %v478_v56 }
 0xac3   :  { %v952_v57 = vpop.eup %951 }
 0xac4   :  { %482 = vrot.lane.b32.xlu2 %v952_v57, %s985_s21 }
 0xb1e   :  { %v483_v59 = vpop.permute.xlu2 %482 }
 0xb1f   :  { %v485_v60 = vmul.f32 %v483_v59, %v479_v58 }
 0xb21   :  { %507 = vrot.lane.b32.xlu1 %v485_v60, %s986_s22 }
 0xb24   :  { %v503_v17 = vpop.permute.xlu0 %502 }
 0xb25   :  { %v505_v19 = vmul.f32 %v503_v17, %v499_v61 }
 0xb27   :  { %511 = vrot.lane.b32.xlu2 %v505_v19, %s985_s21 }
 0xb81   :  { %v512_v23 = vpop.permute.xlu2 %511 }
 0xb93   :  { %v508_v26 = vpop.permute.xlu1 %507 }
 0xb94   :  { %v514_v62 = vsel %vm46_vm0, %v508_v26, %v512_v23 }
 0xb95   :  { %906 = vmatmul.msk.f32.vlgmr.msra.gmra.mxu3 %vm138_vm1, %v514_v62  ;;  %907 = vmatmul.msk.f32.vlgmr.msrb.gmra.mxu1 %vm138_vm1, %v514_v62 }
 0xc12   :  { %v555_v28 = vpop.f32.mrf.mxu1 }
 0xc13   :  { %v556_v30 = vadd.f32 %v555_v28, %v1194_v43 }
 0xc15   :  { %953 = vtanh.f32 %v556_v30  ;;  %v45_v30 = vld [vmem:[%s1391_s0 + $0x38] sm:$0xff] }
 0xc16   :  { %897 = vmatmul.msk.f32.gmra.mxu0 %vm46_vm0, %v45_v30 }
 0xc18   :  { %v535_v0 = vpop.f32.mrf.mxu3 }
 0xc19   :  { %v536_v1 = vadd.f32 %v535_v0, %v104_v35 }
 0xc1b   :  { %v954_v2 = vpop.eup %953  ;;  %955 = vtanh.f32 %v536_v1 }
 0xc1c   :  { %583 = vrot.lane.b32.xlu1 %v954_v2, %s985_s21  ;;  %v580_v4 = vadd.f32 1.0, %v954_v2 }
 0xc1e   :  { %v581_v16 = vmul.f32 %v580_v4, %v498_v51  ;;  %v593_v37 = vmul.f32 0.5, %v580_v4 }
 0xc21   :  { %v956_v3 = vpop.eup %955 }
 0xc22   :  { %563 = vrot.lane.b32.xlu0 %v956_v3, %s985_s21  ;;  %v560_v8 = vadd.f32 1.0, %v956_v3 }
 0xc24   :  { %v561_v11 = vmul.f32 %v560_v8, %v478_v56  ;;  %v573_v40 = vmul.f32 0.5, %v560_v8 }
 0xc8e   :  { %v584_v6 = vpop.permute.xlu1 %583 }
 0xc8f   :  { %v586_v7 = vmul.f32 %v584_v6, %v580_v4 }
 0xc91   :  { %588 = vrot.lane.b32.xlu0 %v586_v7, %s986_s22 }
 0xc93   :  { %v109_v2 = vpop.f32.mrf.mxu0 }
 0xc94   :  { %v564_v9 = vpop.permute.xlu0 %563  ;;  %v110_v3 = vadd.f32 %v109_v2, %v1021_v5 }
 0xc95   :  { %v566_v10 = vmul.f32 %v564_v9, %v560_v8 }
 0xc97   :  { %568 = vrot.lane.b32.xlu2 %v566_v10, %s986_s22 }
 0xcf1   :  { %v569_v12 = vpop.permute.xlu2 %568 }
 0xcf2   :  { %v571_v13 = vadd.f32 %v569_v12, %v561_v11 }
 0xcf4   :  { %v572_v14 = vmul.f32 0.5, %v571_v13 }
 0xcf6   :  { %957 = vtanh.f32 %v572_v14 }
 0xcfc   :  { %v958_v15 = vpop.eup %957 }
 0xcfd   :  { %576 = vrot.lane.b32.xlu1 %v958_v15, %s985_s21 }
 0xd03   :  { %v589_v25 = vpop.permute.xlu0 %588 }
 0xd04   :  { %v591_v32 = vadd.f32 %v589_v25, %v581_v16 }
 0xd06   :  { %v592_v33 = vmul.f32 0.5, %v591_v32 }
 0xd08   :  { %959 = vtanh.f32 %v592_v33 }
 0xd0e   :  { %v960_v34 = vpop.eup %959 }
 0xd0f   :  { %596 = vrot.lane.b32.xlu2 %v960_v34, %s985_s21 }
 0xd69   :  { %v597_v38 = vpop.permute.xlu2 %596 }
 0xd6a   :  { %v599_v39 = vmul.f32 %v597_v38, %v593_v37 }
 0xd6c   :  { %605 = vrot.lane.b32.xlu1 %v599_v39, %s985_s21 }
 0xd6f   :  { %v577_v18 = vpop.permute.xlu1 %576 }
 0xd70   :  { %v579_v20 = vmul.f32 %v577_v18, %v573_v40 }
 0xd72   :  { %601 = vrot.lane.b32.xlu0 %v579_v20, %s986_s22 }
 0xdde   :  { %v606_v24 = vpop.permute.xlu1 %605 }
 0xde4   :  { %v602_v41 = vpop.permute.xlu0 %601 }
 0xde5   :  { %v608_v27 = vsel %vm46_vm0, %v602_v41, %v606_v24 }
 0xde6   :  { %908 = vmatmul.msk.f32.vlgmr.msrb.gmra.mxu2 %vm138_vm1, %v608_v27  ;;  %909 = vmatmul.msk.f32.vlgmr.msrb.gmra.mxu3 %vm138_vm1, %v608_v27 }
 0xe69   :  { %v629_v31 = vpop.f32.mrf.mxu2  ;;  %v649_v44 = vpop.f32.mrf.mxu3 }
 0xe6a   :  { %v630_v45 = vadd.f32 %v629_v31, %v107_v29  ;;  %v650_v36 = vadd.f32 %v649_v44, %v1194_v43 }
 0xe6c   :  { %961 = vtanh.f32 %v630_v45 }
 0xe6d   :  { %963 = vtanh.f32 %v650_v36 }
 0xe72   :  { %v962_v46 = vpop.eup %961 }
 0xe73   :  { %v964_v47 = vpop.eup %963  ;;  %657 = vrot.lane.b32.xlu2 %v962_v46, %s985_s21  ;;  %v654_v48 = vadd.f32 1.0, %v962_v46 }
 0xe74   :  { %677 = vrot.lane.b32.xlu0 %v964_v47, %s985_s21  ;;  %v674_v51 = vadd.f32 1.0, %v964_v47 }
 0xe75   :  { %v655_v54 = vmul.f32 %v654_v48, %v572_v14  ;;  %v667_v21 = vmul.f32 0.5, %v654_v48 }
 0xe76   :  { %v675_v55 = vmul.f32 %v674_v51, %v592_v33  ;;  %v687_v23 = vmul.f32 0.5, %v674_v51 }
 0xecd   :  { %v658_v49 = vpop.permute.xlu2 %657 }
 0xece   :  { %v660_v50 = vmul.f32 %v658_v49, %v654_v48 }
 0xed0   :  { %662 = vrot.lane.b32.xlu1 %v660_v50, %s986_s22 }
 0xee6   :  { %v678_v52 = vpop.permute.xlu0 %677 }
 0xee7   :  { %v680_v53 = vmul.f32 %v678_v52, %v674_v51 }
 0xee9   :  { %682 = vrot.lane.b32.xlu2 %v680_v53, %s986_s22 }
 0xf42   :  { %v663_v56 = vpop.permute.xlu1 %662 }
 0xf43   :  { %v683_v57 = vpop.permute.xlu2 %682  ;;  %v665_v58 = vadd.f32 %v663_v56, %v655_v54  ;;  %v32_v56 = vld [vmem:[%s1390_s1 + $0x98] sm:$0xff] }
 0xf44   :  { %v685_v59 = vadd.f32 %v683_v57, %v675_v55  ;;  %v33_v55 = vld [vmem:[%s1390_s1 + $0xa8] sm:$0xff] }
 0xf45   :  { %v666_v60 = vmul.f32 0.5, %v665_v58  ;;  %v31_v57 = vld [vmem:[%s1390_s1 + $0x88] sm:$0xff] }
 0xf46   :  { %v686_v61 = vmul.f32 0.5, %v685_v59 }
 0xf47   :  { %965 = vtanh.f32 %v666_v60 }
 0xf48   :  { %967 = vtanh.f32 %v686_v61 }
 0xf4d   :  { %v966_v17 = vpop.eup %965 }
 0xf4e   :  { %v968_v19 = vpop.eup %967  ;;  %670 = vrot.lane.b32.xlu0 %v966_v17, %s985_s21  ;;  %v37_v17 = vld [vmem:[%s1390_s1 + $0xc1] ss:$0 sm:$0xff] }
 0xf4f   :  { %690 = vrot.lane.b32.xlu1 %v968_v19, %s985_s21 }
 0xfc0   :  { %v671_v26 = vpop.permute.xlu0 %670 }
 0xfc1   :  { %v691_v62 = vpop.permute.xlu1 %690  ;;  %v673_v28 = vmul.f32 %v671_v26, %v667_v21 }
 0xfc2   :  { %v693_v63 = vmul.f32 %v691_v62, %v687_v23 }
 0xfc3   :  { %695 = vrot.lane.b32.xlu2 %v673_v28, %s986_s22 }
 0xfc4   :  { %699 = vrot.lane.b32.xlu0 %v693_v63, %s985_s21 }
0x101d   :  { %v696_v35 = vpop.permute.xlu2 %695 }
0x1036   :  { %v700_v0 = vpop.permute.xlu0 %699 }
0x1037   :  { %v702_v1 = vsel %vm46_vm0, %v696_v35, %v700_v0 }
0x1038   :  { %910 = vmatmul.msk.f32.vlgmr.msrb.gmra.mxu0 %vm138_vm1, %v702_v1  ;;  %911 = vmatmul.msk.f32.vlgmr.msra.gmra.mxu1 %vm138_vm1, %v702_v1 }
0x10b5   :  { %v723_v4 = vpop.f32.mrf.mxu0  ;;  %v743_v6 = vpop.f32.mrf.mxu1 }
0x10b6   :  { %v724_v7 = vadd.f32 %v723_v4, %v110_v3  ;;  %v744_v8 = vadd.f32 %v743_v6, %v1194_v43 }
0x10b8   :  { %969 = vtanh.f32 %v724_v7 }
0x10b9   :  { %971 = vtanh.f32 %v744_v8 }
0x10be   :  { %v970_v9 = vpop.eup %969 }
0x10bf   :  { %v972_v10 = vpop.eup %971  ;;  %751 = vrot.lane.b32.xlu1 %v970_v9, %s985_s21  ;;  %v748_v14 = vadd.f32 1.0, %v970_v9 }
0x10c0   :  { %771 = vrot.lane.b32.xlu2 %v972_v10, %s985_s21  ;;  %v768_v11 = vadd.f32 1.0, %v972_v10 }
0x10c1   :  { %v749_v37 = vmul.f32 %v748_v14, %v666_v60  ;;  %v761_v20 = vmul.f32 0.5, %v748_v14 }
0x10c2   :  { %v769_v16 = vmul.f32 %v768_v11, %v686_v61  ;;  %v781_v22 = vmul.f32 0.5, %v768_v11 }
0x111a   :  { %v772_v12 = vpop.permute.xlu2 %771 }
0x111b   :  { %v774_v13 = vmul.f32 %v772_v12, %v768_v11 }
0x111d   :  { %776 = vrot.lane.b32.xlu1 %v774_v13, %s986_s22 }
0x1131   :  { %v752_v5 = vpop.permute.xlu1 %751 }
0x1132   :  { %v754_v15 = vmul.f32 %v752_v5, %v748_v14 }
0x1134   :  { %756 = vrot.lane.b32.xlu0 %v754_v15, %s986_s22 }
0x118f   :  { %v777_v25 = vpop.permute.xlu1 %776 }
0x1190   :  { %v779_v32 = vadd.f32 %v777_v25, %v769_v16 }
0x1192   :  { %v780_v33 = vmul.f32 0.5, %v779_v32 }
0x1194   :  { %973 = vtanh.f32 %v780_v33 }
0x119a   :  { %v974_v34 = vpop.eup %973 }
0x119b   :  { %784 = vrot.lane.b32.xlu0 %v974_v34, %s985_s21 }
0x11a6   :  { %v757_v38 = vpop.permute.xlu0 %756 }
0x11a7   :  { %v759_v39 = vadd.f32 %v757_v38, %v749_v37 }
0x11a9   :  { %v760_v40 = vmul.f32 0.5, %v759_v39 }
0x11ab   :  { %975 = vtanh.f32 %v760_v40 }
0x11b1   :  { %v976_v18 = vpop.eup %975 }
0x11b2   :  { %764 = vrot.lane.b32.xlu2 %v976_v18, %s985_s21 }
0x120c   :  { %v765_v24 = vpop.permute.xlu2 %764 }
0x120d   :  { %v785_v41 = vpop.permute.xlu0 %784  ;;  %v767_v27 = vmul.f32 %v765_v24, %v761_v20 }
0x120e   :  { %v787_v42 = vmul.f32 %v785_v41, %v781_v22 }
0x120f   :  { %789 = vrot.lane.b32.xlu1 %v767_v27, %s986_s22 }
0x1210   :  { %793 = vrot.lane.b32.xlu2 %v787_v42, %s985_s21 }
0x126a   :  { %v794_v29 = vpop.permute.xlu2 %793 }
0x1281   :  { %v790_v31 = vpop.permute.xlu1 %789 }
0x1282   :  { %v796_v44 = vsel %vm46_vm0, %v790_v31, %v794_v29 }
0x1283   :  { %912 = vmatmul.msk.f32.vlgmr.msra.gmra.mxu2 %vm138_vm1, %v796_v44 }
0x1306   :  { %v817_v45 = vpop.f32.mrf.mxu2 }
0x1307   :  { %v818_v36 = vadd.f32 %v817_v45, %v1194_v43  ;;  %v34_v43 = vld [vmem:[%s1390_s1 + $0xb8] sm:$0xff] }
0x1308   :  { %858 = vmatpush.msra.mxu3 %v34_v43 }
0x1309   :  { %977 = vtanh.f32 %v818_v36 }
0x130a   :  { %859 = vmatpush.msra.mxu3 %v33_v55 }
0x130c   :  { %860 = vmatpush.msra.mxu3 %v32_v56 }
0x130e   :  { %861 = vmatpush.msra.mxu3 %v31_v57 }
0x130f   :  { %v978_v46 = vpop.eup %977 }
0x1310   :  { %824 = vrot.lane.b32.xlu0 %v978_v46, %s985_s21  ;;  %v821_v47 = vadd.f32 1.0, %v978_v46 }
0x1312   :  { %v822_v50 = vmul.f32 %v821_v47, %v780_v33  ;;  %v834_v58 = vmul.f32 0.5, %v821_v47 }
0x1382   :  { %v825_v48 = vpop.permute.xlu0 %824 }
0x1383   :  { %v827_v49 = vmul.f32 %v825_v48, %v821_v47 }
0x1385   :  { %829 = vrot.lane.b32.xlu1 %v827_v49, %s986_s22 }
0x13f7   :  { %v830_v51 = vpop.permute.xlu1 %829 }
0x13f8   :  { %v832_v52 = vadd.f32 %v830_v51, %v822_v50 }
0x13fa   :  { %v833_v53 = vmul.f32 0.5, %v832_v52 }
0x13fc   :  { %979 = vtanh.f32 %v833_v53 }
0x1402   :  { %v980_v54 = vpop.eup %979 }
0x1403   :  { %837 = vrot.lane.b32.xlu2 %v980_v54, %s985_s21 }
0x145d   :  { %v838_v59 = vpop.permute.xlu2 %837 }
0x145e   :  { %v840_v60 = vmul.f32 %v838_v59, %v834_v58 }
0x1460   :  { %842 = vrot.lane.b32.xlu0 %v840_v60, %s986_s22 }
0x14d2   :  { %v843_v61 = vpop.permute.xlu0 %842 }
0x14d3   :  { %913 = vmatmul.msk.f32.vlgmr.msra.gmra.mxu3 %vm46_vm0, %v843_v61 }
0x1556   :  { %v863_v19 = vpop.f32.mrf.mxu3 }
0x1557   :  { %v864_v21 = vadd.f32 %v863_v19, %v37_v17 }
0x1559   :  { %v914_v23 = vmul.f32 -1.442695, %v864_v21 }
0x155b   :  { %981 = vpow2.f32 %v914_v23 }
0x1561   :  { %v982_v26 = vpop.eup %981 }
0x1562   :  { %v869_v62 = vadd.f32 1.0, %v982_v26 }
0x1564   :  { %983 = vrcp.f32 %v869_v62  ;;  %v881_v35 = vand.u32 2147483648, %v869_v62  ;;  %v879_v1 = vand.u32 2147483647, %v869_v62  ;;  %vm875_vm3 = vweird.f32 %v869_v62 }
0x1566   :  { %v882_v3 = vor.u32 1.1754944e-38, %v881_v35  ;;  %vm880_vm5 = vcmp.eq.f32.partialorder %v879_v1, 8.507059e+37 }
0x156a   :  { %v984_v28 = vpop.eup %983 }
0x156b   :  { %v871_v63 = vmul.f32 %v984_v28, %v869_v62  ;;  %vm876_vm2 = vweird.f32 %v984_v28 }
0x156c   :  { %vm877_vm4 = vmor %vm875_vm3, %vm876_vm2 }
0x156d   :  { %v872_v30 = vsub.f32 1.0, %v871_v63 }
0x156f   :  { %v873_v0 = vmul.f32 %v984_v28, %v872_v30 }
0x1571   :  { %v874_v2 = vadd.f32 %v984_v28, %v873_v0 }
0x1573   :  { %v878_v4 = vsel %vm877_vm4, %v984_v28, %v874_v2 }
0x1574   :  { %v883_v6 = vsel %vm880_vm5, %v882_v3, %v878_v4 }
0x1575   :  { %885 = vst [vmem:[%s1392_s2] sm:$0xff] %v883_v6 }

</bundles_post_ra>
